<compile_context>
chip_gen: v7x
topology: tpu7x:2x2x1
jax: 0.10.0
libtpu: 0.0.40
codegen_flags: <defaults>
</compile_context>

<pallas_src>
import functools

import jax
import jax.numpy as jnp
from jax import lax
from jax.experimental import pallas as pl
from jax.experimental.pallas import tpu as pltpu
import numpy as np


# ------------------------------ fused kernel --------------------------------

def _cnn_fused_kernel(x_ref, w1_ref, b1_ref, w2_ref, b2_ref,
                      wl_ref, bl_ref, wo_ref, bo_ref, o_ref):
    f32 = jnp.float32

    def conv_pool_relu(x_bf16, w_ref, b_ref):
        # One dense matmul gives the conv output at all 4 pool offsets (columns grouped by
        # offset); the 2x2 max-pool is a 4-way max over aligned lane blocks; bias + ReLU are
        # applied after the max (mathematically identical to conv -> ReLU -> maxpool).
        y = jnp.dot(x_bf16, w_ref[...], preferred_element_type=f32)
        q = y.shape[1] // 4                                   # 512 / 256 -> aligned slices
        m = jnp.maximum(jnp.maximum(y[:, 0:q], y[:, q:2 * q]),
                        jnp.maximum(y[:, 2 * q:3 * q], y[:, 3 * q:4 * q]))
        return jnp.maximum(m + b_ref[...], 0.0)               # f32 elementwise (VPU)

    p1 = conv_pool_relu(x_ref[...], w1_ref, b1_ref)               # [NB, (H/2)(W/2)C1]
    p2 = conv_pool_relu(p1.astype(jnp.bfloat16), w2_ref, b2_ref)  # [NB, (H/4)(W/4)C2]

    # Head: single K=256 matmul (flatten order pre-folded into wl rows), K-major wo.
    h = jnp.dot(p2.astype(jnp.bfloat16), wl_ref[...],
                preferred_element_type=f32) + bl_ref[...]         # [NB, L1]
    logits = jnp.dot(h.astype(jnp.bfloat16), wo_ref[...],
                     preferred_element_type=f32) + bo_ref[...]    # [NB, OUT]

    mx = jnp.max(logits, axis=-1, keepdims=True)
    e = jnp.exp(logits - mx)
    inv = pl.reciprocal(jnp.sum(e, axis=-1, keepdims=True), approx=True)
    o_ref[...] = e * inv


# ------------------------- weight preparation (host) -------------------------

def _dense_conv_pool_matrix(wconv, hw, channels_last_input):
    """Densify a 3x3 / stride-1 / pad-1 conv over an hw x hw grid into one matrix whose
    output columns are grouped by 2x2 max-pool offset.

    Shape [IC*hw*hw, 4 * (hw//2)**2 * OC]:
      row = (ih*hw + iw)*IC + ic   if channels_last_input else   ic*hw*hw + ih*hw + iw
      col = g*(PH*PW*OC) + (ph*PW + pw)*OC + oc  with g = 2i+j the pool offset and the conv
            evaluated at output pixel (2ph+i, 2pw+j); spatial zero-padding taps are skipped.
    """
    wc = np.asarray(wconv, np.float32)                 # [OC, IC, 3, 3]
    oc_n, ic_n, kh, kw = wc.shape
    assert (kh, kw) == (3, 3)
    h = w = hw
    ph_n, pw_n = h // 2, w // 2
    mat = np.zeros((ic_n * h * w, 4 * ph_n * pw_n * oc_n), np.float32)
    for ph in range(ph_n):
        for pw in range(pw_n):
            for gi in range(2):
                for gj in range(2):
                    col0 = ((2 * gi + gj) * ph_n * pw_n + ph * pw_n + pw) * oc_n
                    oh, ow = 2 * ph + gi, 2 * pw + gj
                    for di in range(3):
                        for dj in range(3):
                            ih, iw = oh + di - 1, ow + dj - 1
                            if not (0 <= ih < h and 0 <= iw < w):
                                continue                       # zero padding
                            for ic in range(ic_n):
                                row = ((ih * w + iw) * ic_n + ic if channels_last_input
                                       else ic * h * w + ih * w + iw)
                                mat[row, col0:col0 + oc_n] += wc[:, ic, di, dj]
    return mat


def prepare_params(params, h, w):
    """One-time repack of PyTorch-layout weights into kernel-ready, device-resident form."""
    assert h % 4 == 0 and w % 4 == 0
    c1, _, _, _ = params["w1c"].shape
    c2, ic2, _, _ = params["w2c"].shape
    assert ic2 == c1
    ph2, pw2 = h // 4, w // 4                          # spatial extent after two 2x2 pools
    lin_out, lin_in = params["wl"].shape
    assert lin_in == c2 * ph2 * pw2

    # conv1 (+pool regroup): rows follow the raw NCHW flatten, so the wrapper is a reshape.
    w1d = _dense_conv_pool_matrix(params["w1c"], h, channels_last_input=False)
    # conv2 (+pool regroup): rows follow the (spatial, channel) order produced by stage 1.
    w2d = _dense_conv_pool_matrix(params["w2c"], h // 2, channels_last_input=True)

    # first Linear: fold PyTorch's NCHW flatten order (c*S + spatial) into a row permutation
    # so one K=256 matmul consumes the kernel's (spatial, channel) feature order directly.
    wl = np.asarray(params["wl"], np.float32).reshape(lin_out, c2, ph2, pw2)
    wlk = wl.transpose(2, 3, 1, 0).reshape(ph2 * pw2 * c2, lin_out)

    b1 = np.tile(np.asarray(params["b1c"], np.float32), (h // 2) * (w // 2))
    b2 = np.tile(np.asarray(params["b2c"], np.float32), ph2 * pw2)

    return {
        "w1": jnp.asarray(w1d, jnp.bfloat16),                      # [IC*H*W, 4*(H/2)(W/2)*C1]
        "b1": jnp.asarray(b1.reshape(1, -1), jnp.float32),
        "w2": jnp.asarray(w2d, jnp.bfloat16),                      # [(H/2)(W/2)*C1, 4*S2*C2]
        "b2": jnp.asarray(b2.reshape(1, -1), jnp.float32),
        "wl": jnp.asarray(wlk, jnp.bfloat16),                      # [S2*C2, L1]
        "bl": jnp.asarray(np.asarray(params["bl"]).reshape(1, -1), jnp.float32),
        "wo": jnp.asarray(np.asarray(params["wo"]).T, jnp.bfloat16),   # [L1, OUT], K-major
        "bo": jnp.asarray(np.asarray(params["bo"]).reshape(1, -1), jnp.float32),
    }


# --------------------------------- wrapper ------------------------------------

_BLOCK_N = 8   # batch rows per grid step (sublane-aligned); raise toward 128 for big batches


@functools.partial(jax.jit, static_argnames=("block_n",))
def cnn_forward(x_nchw, kparams, *, block_n=_BLOCK_N):
    """Pallas implementation of CNN.forward (whole network fused, batch gridded)."""
    n = x_nchw.shape[0]
    feat = int(np.prod(x_nchw.shape[1:]))
    n_pad = ((n + block_n - 1) // block_n) * block_n

    # NCHW flatten order is baked into the dense conv1 rows: just reshape (+pad) under jit.
    x_flat = x_nchw.reshape(n, feat).astype(jnp.bfloat16)
    if n_pad != n:
        x_flat = jnp.pad(x_flat, ((0, n_pad - n), (0, 0)))

    n_out = kparams["bo"].shape[-1]
    w_args = (kparams["w1"], kparams["b1"], kparams["w2"], kparams["b2"],
              kparams["wl"], kparams["bl"], kparams["wo"], kparams["bo"])
    # Weights/biases: full-array, grid-invariant blocks (fetched once, stay VMEM-resident).
    resident = [pl.BlockSpec(a.shape, lambda i: (0, 0)) for a in w_args]

    out = pl.pallas_call(
        _cnn_fused_kernel,
        grid=(n_pad // block_n,),
        out_shape=jax.ShapeDtypeStruct((n_pad, n_out), jnp.float32),
        in_specs=[pl.BlockSpec((block_n, feat), lambda i: (i, 0))] + resident,
        out_specs=pl.BlockSpec((block_n, n_out), lambda i: (i, 0)),
        compiler_params=pltpu.CompilerParams(
            dimension_semantics=("parallel",)),   # v7x: both TensorCores split batch blocks
    )(x_flat, *w_args)
    return out[:n]


# --------------------------- pure-JAX reference -----------------------------

def _ref_forward(x_nchw, params):
    def conv_block(x, w, b):
        y = lax.conv_general_dilated(
            x, w, (1, 1), [(1, 1), (1, 1)],
            dimension_numbers=("NCHW", "OIHW", "NCHW"))
        y = jnp.maximum(y + b[None, :, None, None], 0.0)
        n, c, h, w2 = y.shape
        return y.reshape(n, c, h // 2, 2, w2 // 2, 2).max(axis=(3, 5))

    y = conv_block(x_nchw, params["w1c"], params["b1c"])
    y = conv_block(y, params["w2c"], params["b2c"])
    y = y.reshape(y.shape[0], -1)
    h = y @ params["wl"].T + params["bl"]
    logits = h @ params["wo"].T + params["bo"]
    return jax.nn.softmax(logits, axis=1)


# --------------------------------- main --------------------------------------

if __name__ == "__main__":
    # Module config: conv1=(1,8,3,1,1), conv2=(8,16,3,1,1), linear=(256,32,10)
    key = jax.random.PRNGKey(0)
    ks = jax.random.split(key, 9)

    N, IC, H, W = 2, 1, 16, 16
    x = jax.random.normal(ks[0], (N, IC, H, W), jnp.float32)

    params = {
        "w1c": jax.random.normal(ks[1], (8, 1, 3, 3), jnp.float32) * 0.2,
        "b1c": jax.random.normal(ks[2], (8,), jnp.float32) * 0.1,
        "w2c": jax.random.normal(ks[3], (16, 8, 3, 3), jnp.float32) * 0.1,
        "b2c": jax.random.normal(ks[4], (16,), jnp.float32) * 0.1,
        "wl":  jax.random.normal(ks[5], (32, 256), jnp.float32) * 0.05,   # nn.Linear (out, in)
        "bl":  jax.random.normal(ks[6], (32,), jnp.float32) * 0.1,
        "wo":  jax.random.normal(ks[7], (10, 32), jnp.float32) * 0.1,
        "bo":  jax.random.normal(ks[8], (10,), jnp.float32) * 0.1,
    }

    kparams = prepare_params(params, H, W)       # one-time repack -> device-resident constants

    out = jax.block_until_ready(cnn_forward(x, kparams))
    ref = jax.block_until_ready(_ref_forward(x, params))

    assert out.shape == (N, 10), out.shape
    # bf16 matmul operands + approximate reciprocal => loosened tolerances vs f32 reference.
    np.testing.assert_allclose(np.asarray(out), np.asarray(ref), rtol=5e-2, atol=5e-3)
    np.testing.assert_allclose(np.asarray(out).sum(axis=1), np.ones(N), atol=1e-2)

    print("KERNEL_OK")
</pallas_src>

<mosaic_0001>
module attributes {stable_mosaic.version = 11 : i64} {
  func.func @_cnn_fused_kernel(%arg0: i32, %arg1: memref<8x256xbf16, #tpu.memory_space<vmem>>, %arg2: memref<256x2048xbf16, #tpu.memory_space<vmem>>, %arg3: memref<1x512xf32, #tpu.memory_space<vmem>>, %arg4: memref<512x1024xbf16, #tpu.memory_space<vmem>>, %arg5: memref<1x256xf32, #tpu.memory_space<vmem>>, %arg6: memref<256x32xbf16, #tpu.memory_space<vmem>>, %arg7: memref<1x32xf32, #tpu.memory_space<vmem>>, %arg8: memref<32x10xbf16, #tpu.memory_space<vmem>>, %arg9: memref<1x10xf32, #tpu.memory_space<vmem>>, %arg10: memref<8x10xf32, #tpu.memory_space<vmem>>) attributes {dimension_semantics = [#tpu.dimension_semantics<parallel>], iteration_bounds = array<i64: 1>, scalar_prefetch = 0 : i64, scratch_operands = 0 : i64, tpu.core_type = #tpu.core_type<tc>, window_params = [{transform_indices = @transform_0, window_bounds = array<i64: 8, 256>}, {pipeline_mode = #tpu.pipeline_mode<synchronous>, transform_indices = @transform_1, window_bounds = array<i64: 256, 2048>}, {pipeline_mode = #tpu.pipeline_mode<synchronous>, transform_indices = @transform_2, window_bounds = array<i64: 1, 512>}, {pipeline_mode = #tpu.pipeline_mode<synchronous>, transform_indices = @transform_3, window_bounds = array<i64: 512, 1024>}, {pipeline_mode = #tpu.pipeline_mode<synchronous>, transform_indices = @transform_4, window_bounds = array<i64: 1, 256>}, {pipeline_mode = #tpu.pipeline_mode<synchronous>, transform_indices = @transform_5, window_bounds = array<i64: 256, 32>}, {pipeline_mode = #tpu.pipeline_mode<synchronous>, transform_indices = @transform_6, window_bounds = array<i64: 1, 32>}, {pipeline_mode = #tpu.pipeline_mode<synchronous>, transform_indices = @transform_7, window_bounds = array<i64: 32, 10>}, {pipeline_mode = #tpu.pipeline_mode<synchronous>, transform_indices = @transform_8, window_bounds = array<i64: 1, 10>}, {transform_indices = @transform_9, window_bounds = array<i64: 8, 10>}]} {
    %c0 = arith.constant 0 : index
    %c0_0 = arith.constant 0 : index
    %0 = vector.load %arg1[%c0, %c0_0] : memref<8x256xbf16, #tpu.memory_space<vmem>>, vector<8x256xbf16>
    %c0_1 = arith.constant 0 : index
    %c0_2 = arith.constant 0 : index
    %1 = vector.load %arg2[%c0_1, %c0_2] : memref<256x2048xbf16, #tpu.memory_space<vmem>>, vector<256x2048xbf16>
    %cst = arith.constant dense<0.000000e+00> : vector<8x2048xf32>
    %2 = tpu.matmul %0, %1, %cst {dimension_numbers = #tpu.dot_dimension_numbers<[1], [0], [0], [1], [0, 0, 1, 1], [], []>} : vector<8x256xbf16>, vector<256x2048xbf16>, vector<8x2048xf32> -> vector<8x2048xf32>
    %3 = vector.extract_strided_slice %2 {offsets = [0, 0], sizes = [8, 512], strides = [1, 1]} : vector<8x2048xf32> to vector<8x512xf32>
    %4 = vector.extract_strided_slice %2 {offsets = [0, 512], sizes = [8, 512], strides = [1, 1]} : vector<8x2048xf32> to vector<8x512xf32>
    %5 = arith.maximumf %3, %4 : vector<8x512xf32>
    %6 = vector.extract_strided_slice %2 {offsets = [0, 1024], sizes = [8, 512], strides = [1, 1]} : vector<8x2048xf32> to vector<8x512xf32>
    %7 = vector.extract_strided_slice %2 {offsets = [0, 1536], sizes = [8, 512], strides = [1, 1]} : vector<8x2048xf32> to vector<8x512xf32>
    %8 = arith.maximumf %6, %7 : vector<8x512xf32>
    %9 = arith.maximumf %5, %8 : vector<8x512xf32>
    %c0_3 = arith.constant 0 : index
    %c0_4 = arith.constant 0 : index
    %10 = vector.load %arg3[%c0_3, %c0_4] : memref<1x512xf32, #tpu.memory_space<vmem>>, vector<1x512xf32>
    %11 = vector.broadcast %10 : vector<1x512xf32> to vector<8x512xf32>
    %12 = arith.addf %9, %11 : vector<8x512xf32>
    %cst_5 = arith.constant 0.000000e+00 : f32
    %13 = vector.broadcast %cst_5 : f32 to vector<8x512xf32>
    %14 = arith.maximumf %12, %13 : vector<8x512xf32>
    %15 = arith.truncf %14 : vector<8x512xf32> to vector<8x512xbf16>
    %c0_6 = arith.constant 0 : index
    %c0_7 = arith.constant 0 : index
    %16 = vector.load %arg4[%c0_6, %c0_7] : memref<512x1024xbf16, #tpu.memory_space<vmem>>, vector<512x1024xbf16>
    %cst_8 = arith.constant dense<0.000000e+00> : vector<8x1024xf32>
    %17 = tpu.matmul %15, %16, %cst_8 {dimension_numbers = #tpu.dot_dimension_numbers<[1], [0], [0], [1], [0, 0, 1, 1], [], []>} : vector<8x512xbf16>, vector<512x1024xbf16>, vector<8x1024xf32> -> vector<8x1024xf32>
    %18 = vector.extract_strided_slice %17 {offsets = [0, 0], sizes = [8, 256], strides = [1, 1]} : vector<8x1024xf32> to vector<8x256xf32>
    %19 = vector.extract_strided_slice %17 {offsets = [0, 256], sizes = [8, 256], strides = [1, 1]} : vector<8x1024xf32> to vector<8x256xf32>
    %20 = arith.maximumf %18, %19 : vector<8x256xf32>
    %21 = vector.extract_strided_slice %17 {offsets = [0, 512], sizes = [8, 256], strides = [1, 1]} : vector<8x1024xf32> to vector<8x256xf32>
    %22 = vector.extract_strided_slice %17 {offsets = [0, 768], sizes = [8, 256], strides = [1, 1]} : vector<8x1024xf32> to vector<8x256xf32>
    %23 = arith.maximumf %21, %22 : vector<8x256xf32>
    %24 = arith.maximumf %20, %23 : vector<8x256xf32>
    %c0_9 = arith.constant 0 : index
    %c0_10 = arith.constant 0 : index
    %25 = vector.load %arg5[%c0_9, %c0_10] : memref<1x256xf32, #tpu.memory_space<vmem>>, vector<1x256xf32>
    %26 = vector.broadcast %25 : vector<1x256xf32> to vector<8x256xf32>
    %27 = arith.addf %24, %26 : vector<8x256xf32>
    %cst_11 = arith.constant 0.000000e+00 : f32
    %28 = vector.broadcast %cst_11 : f32 to vector<8x256xf32>
    %29 = arith.maximumf %27, %28 : vector<8x256xf32>
    %30 = arith.truncf %29 : vector<8x256xf32> to vector<8x256xbf16>
    %c0_12 = arith.constant 0 : index
    %c0_13 = arith.constant 0 : index
    %31 = vector.load %arg6[%c0_12, %c0_13] : memref<256x32xbf16, #tpu.memory_space<vmem>>, vector<256x32xbf16>
    %cst_14 = arith.constant dense<0.000000e+00> : vector<8x32xf32>
    %32 = tpu.matmul %30, %31, %cst_14 {dimension_numbers = #tpu.dot_dimension_numbers<[1], [0], [0], [1], [0, 0, 1, 1], [], []>} : vector<8x256xbf16>, vector<256x32xbf16>, vector<8x32xf32> -> vector<8x32xf32>
    %c0_15 = arith.constant 0 : index
    %c0_16 = arith.constant 0 : index
    %33 = vector.load %arg7[%c0_15, %c0_16] : memref<1x32xf32, #tpu.memory_space<vmem>>, vector<1x32xf32>
    %34 = vector.broadcast %33 : vector<1x32xf32> to vector<8x32xf32>
    %35 = arith.addf %32, %34 : vector<8x32xf32>
    %36 = arith.truncf %35 : vector<8x32xf32> to vector<8x32xbf16>
    %c0_17 = arith.constant 0 : index
    %c0_18 = arith.constant 0 : index
    %37 = vector.load %arg8[%c0_17, %c0_18] : memref<32x10xbf16, #tpu.memory_space<vmem>>, vector<32x10xbf16>
    %cst_19 = arith.constant dense<0.000000e+00> : vector<8x10xf32>
    %38 = tpu.matmul %36, %37, %cst_19 {dimension_numbers = #tpu.dot_dimension_numbers<[1], [0], [0], [1], [0, 0, 1, 1], [], []>} : vector<8x32xbf16>, vector<32x10xbf16>, vector<8x10xf32> -> vector<8x10xf32>
    %c0_20 = arith.constant 0 : index
    %c0_21 = arith.constant 0 : index
    %39 = vector.load %arg9[%c0_20, %c0_21] : memref<1x10xf32, #tpu.memory_space<vmem>>, vector<1x10xf32>
    %40 = vector.broadcast %39 : vector<1x10xf32> to vector<8x10xf32>
    %41 = arith.addf %38, %40 : vector<8x10xf32>
    %cst_22 = arith.constant dense<0xFF800000> : vector<8xf32>
    %42 = vector.multi_reduction <maximumf>, %41, %cst_22 [1] : vector<8x10xf32> to vector<8xf32>
    %43 = vector.shape_cast %42 : vector<8xf32> to vector<8x1xf32>
    %44 = vector.broadcast %43 : vector<8x1xf32> to vector<8x10xf32>
    %45 = arith.subf %41, %44 : vector<8x10xf32>
    %46 = math.exp %45 : vector<8x10xf32>
    %cst_23 = arith.constant dense<0.000000e+00> : vector<8xf32>
    %47 = vector.multi_reduction <add>, %46, %cst_23 [1] : vector<8x10xf32> to vector<8xf32>
    %48 = vector.shape_cast %47 : vector<8xf32> to vector<8x1xf32>
    %49 = tpu.reciprocal %48 {approx = true} : vector<8x1xf32> -> vector<8x1xf32>
    %50 = vector.broadcast %49 : vector<8x1xf32> to vector<8x10xf32>
    %51 = arith.mulf %46, %50 : vector<8x10xf32>
    %c0_24 = arith.constant 0 : index
    %c0_25 = arith.constant 0 : index
    %52 = vector.load %arg10[%c0_24, %c0_25] : memref<8x10xf32, #tpu.memory_space<vmem>>, vector<8x10xf32>
    tpu.vector_store %arg10[%c0_24, %c0_25], %51 {strides = array<i32>} : memref<8x10xf32, #tpu.memory_space<vmem>>, vector<8x10xf32>,
    return
  }
  func.func @transform_0(%arg0: i32) -> (i32, i32) {
    %c0_i32 = arith.constant 0 : i32
    %c0_i32_0 = arith.constant 0 : i32
    return %arg0, %c0_i32 : i32, i32
  }
  func.func @transform_1(%arg0: i32) -> (i32, i32) {
    %c0_i32 = arith.constant 0 : i32
    %c0_i32_0 = arith.constant 0 : i32
    %c0_i32_1 = arith.constant 0 : i32
    return %c0_i32, %c0_i32_0 : i32, i32
  }
  func.func @transform_2(%arg0: i32) -> (i32, i32) {
    %c0_i32 = arith.constant 0 : i32
    %c0_i32_0 = arith.constant 0 : i32
    %c0_i32_1 = arith.constant 0 : i32
    return %c0_i32, %c0_i32_0 : i32, i32
  }
  func.func @transform_3(%arg0: i32) -> (i32, i32) {
    %c0_i32 = arith.constant 0 : i32
    %c0_i32_0 = arith.constant 0 : i32
    %c0_i32_1 = arith.constant 0 : i32
    return %c0_i32, %c0_i32_0 : i32, i32
  }
  func.func @transform_4(%arg0: i32) -> (i32, i32) {
    %c0_i32 = arith.constant 0 : i32
    %c0_i32_0 = arith.constant 0 : i32
    %c0_i32_1 = arith.constant 0 : i32
    return %c0_i32, %c0_i32_0 : i32, i32
  }
  func.func @transform_5(%arg0: i32) -> (i32, i32) {
    %c0_i32 = arith.constant 0 : i32
    %c0_i32_0 = arith.constant 0 : i32
    %c0_i32_1 = arith.constant 0 : i32
    return %c0_i32, %c0_i32_0 : i32, i32
  }
  func.func @transform_6(%arg0: i32) -> (i32, i32) {
    %c0_i32 = arith.constant 0 : i32
    %c0_i32_0 = arith.constant 0 : i32
    %c0_i32_1 = arith.constant 0 : i32
    return %c0_i32, %c0_i32_0 : i32, i32
  }
  func.func @transform_7(%arg0: i32) -> (i32, i32) {
    %c0_i32 = arith.constant 0 : i32
    %c0_i32_0 = arith.constant 0 : i32
    %c0_i32_1 = arith.constant 0 : i32
    return %c0_i32, %c0_i32_0 : i32, i32
  }
  func.func @transform_8(%arg0: i32) -> (i32, i32) {
    %c0_i32 = arith.constant 0 : i32
    %c0_i32_0 = arith.constant 0 : i32
    %c0_i32_1 = arith.constant 0 : i32
    return %c0_i32, %c0_i32_0 : i32, i32
  }
  func.func @transform_9(%arg0: i32) -> (i32, i32) {
    %c0_i32 = arith.constant 0 : i32
    %c0_i32_0 = arith.constant 0 : i32
    return %arg0, %c0_i32 : i32, i32
  }
}

</mosaic_0001>

<bundles_post_ra>
// kernel: cnn_forward.1
= control target key start
LH: loop header
LB: loop body
LE: loop exit
PB: predicated region body
PF: predicated region fallthrough
CT: control target
= control target key end

     0   :  { %14 = vsyncpa [#allocation3], 0  ;;  %s5068_s0 = inlined_call_operand.vmem [shape: bf16[8,256], index: 0, kind: input, shape index: {}]   ;;  %s5069_s1 = inlined_call_operand.hbm [shape: bf16[256,2048], index: 1, kind: input, shape index: {}]   ;;  %s5070_s2 = inlined_call_operand.vmem [shape: f32[1,512], index: 2, kind: input, shape index: {}]   ;;  %s5071_s3 = inlined_call_operand.hbm [shape: bf16[512,1024], index: 3, kind: input, shape index: {}]   ;;  %s5072_s4 = inlined_call_operand.vmem [shape: f32[1,256], index: 4, kind: input, shape index: {}]   ;;  %s5073_s5 = inlined_call_operand.vmem [shape: bf16[256,32], index: 5, kind: input, shape index: {}]   ;;  %s5074_s6 = inlined_call_operand.vmem [shape: f32[1,32], index: 6, kind: input, shape index: {}]   ;;  %s5075_s7 = inlined_call_operand.vmem [shape: bf16[32,10], index: 7, kind: input, shape index: {}]   ;;  %s5076_s8 = inlined_call_operand.vmem [shape: f32[1,10], index: 8, kind: input, shape index: {}]   ;;  %s5077_s9 = inlined_call_operand.vmem [shape: f32[8,10], index: 9, kind: output, shape index: {}]  }
   0x1   :  { %15 = vsyncpa [#allocation5], 0  ;;  %s4793_s30 = smov [#allocation2]   ;;  %s4745_s13 = scalar_lea.hbm %s5069_s1, 32768 }
   0x2   :  { %s23_s10 = sshll.u32 %s4793_s30, 4  ;;  %p4746_p0 = scmp.ne.s32.totalorder %s5069_s1, %s4745_s13  ;;  %s24_s10 = int_to_ptr.vmem [resolvable:$true] %s23_s10 }
   0x3   :  { %p4749_p1 = scmp.lt.u32.totalorder %s4745_s13, %s5069_s1 }
   0x5   :  { %p4751_p2 = pnand %p4749_p1, %p4746_p0 }
   0x7   :  { %4754 = shalt.err (!%p4751_p2)
}
   0x8   :  { %s4755_s18 = scalar_lea.vmem %s24_s10, 32768  ;;  %p4760_p4 = scmp.lt.s32.totalorder %s24_s10, %s24_s10 }
   0x9   :  { %p4756_p3 = scmp.ne.s32.totalorder %s24_s10, %s4755_s18  ;;  %p4761_p5 = scmp.lt.s32.totalorder %s4755_s18, %s4755_s18 }
   0xb   :  { %p4762_p6 = por %p4761_p5, %p4760_p4 }
   0xd   :  { %p4763_p7 = pnand %p4762_p6, %p4756_p3 }
   0xf   :  { %4766 = shalt.err (!%p4763_p7)
}
  0x10   :  { %s4794_s19 = smov 1024   ;;  %s4795_s20 = smov 64  }
  0x11   :  { %29 = dma.hbm_to_vmem [thread:$0]  %s5069_s1, 32768, %s24_s10, [#allocation3], %s4794_s19, %s4794_s19, %s4795_s20  }
  0x12   :  { %s4796_s23 = smov [#allocation4]   ;;  %s4767_s27 = scalar_lea.hbm %s5071_s3, 32768 }
  0x13   :  { %s37_s24 = sshll.u32 %s4796_s23, 4  ;;  %p4768_p8 = scmp.ne.s32.totalorder %s5071_s3, %s4767_s27  ;;  %s38_s24 = int_to_ptr.vmem [resolvable:$true] %s37_s24 }
  0x14   :  { %p4771_p9 = scmp.lt.u32.totalorder %s4767_s27, %s5071_s3 }
  0x16   :  { %p4773_p10 = pnand %p4771_p9, %p4768_p8 }
  0x18   :  { %4776 = shalt.err (!%p4773_p10)
}
  0x19   :  { %s4777_s12 = scalar_lea.vmem %s38_s24, 32768  ;;  %p4782_p12 = scmp.lt.s32.totalorder %s38_s24, %s38_s24 }
  0x1a   :  { %p4778_p11 = scmp.ne.s32.totalorder %s38_s24, %s4777_s12  ;;  %p4783_p13 = scmp.lt.s32.totalorder %s4777_s12, %s4777_s12 }
  0x1c   :  { %p4784_p0 = por %p4783_p13, %p4782_p12 }
  0x1e   :  { %p4785_p1 = pnand %p4784_p0, %p4778_p11 }
  0x20   :  { %4788 = shalt.err (!%p4785_p1)
}
  0x21   :  { %s4797_s1 = smov 512   ;;  %s4798_s10 = smov 32  }
  0x22   :  { %43 = dma.hbm_to_vmem [thread:$0]  %s5071_s3, 32768, %s38_s24, [#allocation5], %s4797_s1, %s4797_s1, %s4798_s10  }
  0x23   :  { %4789 = dma.done.wait [#allocation3], 32768  }
  0x24   :  { %4790 = vsyncadd [#allocation3], 4294934528 }
  0x25   :  { %4791 = dma.done.wait [#allocation5], 32768  }
  0x26   :  { %4792 = vsyncadd [#allocation5], 4294934528  ;;  %v62_v0 = vld [vmem:[#allocation2] sm:$0xff]  ;;  %v63_v2 = vld [vmem:[#allocation2 + $0x8] sm:$0xff]  ;;  %vm4800_vm0 = vmmov 0   ;;  %vm4066_vm1 = vcmask 261120  }
  0x27   :  { %v70_v1 = vld [vmem:[#allocation2 + $0x40] sm:$0xff]  ;;  %v71_v4 = vld [vmem:[#allocation2 + $0x48] sm:$0xff]  ;;  %vm4110_vm2 = vcmask 80896  }
  0x28   :  { %v4132_v3 = vcombine.high %v62_v0, %v70_v1  ;;  %v4131_v5 = vcombine.low %v62_v0, %v70_v1  ;;  %v78_v6 = vld [vmem:[#allocation2 + $0x80] sm:$0xff]  ;;  %v4134_v8 = vcombine.high %v63_v2, %v71_v4  ;;  %v4133_v9 = vcombine.low %v63_v2, %v71_v4  ;;  %v79_v11 = vld [vmem:[#allocation2 + $0x88] sm:$0xff] }
  0x29   :  { %v86_v7 = vld [vmem:[#allocation2 + $0xc0] sm:$0xff]  ;;  %v87_v12 = vld [vmem:[#allocation2 + $0xc8] sm:$0xff] }
  0x2a   :  { %v4148_v10 = vcombine.high %v78_v6, %v86_v7  ;;  %v94_v13 = vld [vmem:[#allocation2 + $0x100] sm:$0xff]  ;;  %1605 = vmatprep.subr.bf16.mxu0 %v4132_v3  ;;  %v4150_v14 = vcombine.high %v79_v11, %v87_v12  ;;  %v95_v16 = vld [vmem:[#allocation2 + $0x108] sm:$0xff]  ;;  %1646 = vmatprep.subr.bf16.mxu1 %v4134_v8  ;;  %v4147_v18 = vcombine.low %v78_v6, %v86_v7 }
  0x2b   :  { %v102_v15 = vld [vmem:[#allocation2 + $0x140] sm:$0xff]  ;;  %v103_v17 = vld [vmem:[#allocation2 + $0x148] sm:$0xff]  ;;  %1606 = vmatpush1.bf16.msra.mxu0 %v4131_v5  ;;  %1647 = vmatpush1.bf16.msra.mxu1 %v4133_v9  ;;  %v4149_v19 = vcombine.low %v79_v11, %v87_v12 }
  0x2c   :  { %1607 = vmatprep.subr.bf16.mxu0 %v4148_v10  ;;  %v4164_v20 = vcombine.high %v94_v13, %v102_v15  ;;  %1648 = vmatprep.subr.bf16.mxu1 %v4150_v14  ;;  %v4166_v21 = vcombine.high %v95_v16, %v103_v17  ;;  %v110_v22 = vld [vmem:[#allocation2 + $0x180] sm:$0xff]  ;;  %v111_v24 = vld [vmem:[#allocation2 + $0x188] sm:$0xff]  ;;  %v4163_v26 = vcombine.low %v94_v13, %v102_v15 }
  0x2d   :  { %v118_v23 = vld [vmem:[#allocation2 + $0x1c0] sm:$0xff]  ;;  %v119_v25 = vld [vmem:[#allocation2 + $0x1c8] sm:$0xff]  ;;  %v4165_v27 = vcombine.low %v95_v16, %v103_v17 }
  0x2e   :  { %v4180_v28 = vcombine.high %v110_v22, %v118_v23  ;;  %v4182_v29 = vcombine.high %v111_v24, %v119_v25  ;;  %v126_v30 = vld [vmem:[#allocation2 + $0x200] sm:$0xff]  ;;  %v127_v32 = vld [vmem:[#allocation2 + $0x208] sm:$0xff]  ;;  %v4179_v34 = vcombine.low %v110_v22, %v118_v23  ;;  %v4181_v35 = vcombine.low %v111_v24, %v119_v25 }
  0x2f   :  { %1608 = vmatpush1.bf16.msra.mxu0 %v4147_v18  ;;  %1649 = vmatpush1.bf16.msra.mxu1 %v4149_v19  ;;  %v134_v31 = vld [vmem:[#allocation2 + $0x240] sm:$0xff]  ;;  %v135_v33 = vld [vmem:[#allocation2 + $0x248] sm:$0xff] }
  0x30   :  { %1609 = vmatprep.subr.bf16.mxu0 %v4164_v20  ;;  %1650 = vmatprep.subr.bf16.mxu1 %v4166_v21  ;;  %v4196_v36 = vcombine.high %v126_v30, %v134_v31  ;;  %v4198_v37 = vcombine.high %v127_v32, %v135_v33  ;;  %v142_v38 = vld [vmem:[#allocation2 + $0x280] sm:$0xff]  ;;  %v143_v40 = vld [vmem:[#allocation2 + $0x288] sm:$0xff]  ;;  %v4195_v42 = vcombine.low %v126_v30, %v134_v31 }
  0x31   :  { %v150_v39 = vld [vmem:[#allocation2 + $0x2c0] sm:$0xff]  ;;  %v151_v41 = vld [vmem:[#allocation2 + $0x2c8] sm:$0xff]  ;;  %v4197_v43 = vcombine.low %v127_v32, %v135_v33 }
  0x32   :  { %v4212_v44 = vcombine.high %v142_v38, %v150_v39  ;;  %v4214_v45 = vcombine.high %v143_v40, %v151_v41  ;;  %v158_v46 = vld [vmem:[#allocation2 + $0x300] sm:$0xff]  ;;  %v159_v48 = vld [vmem:[#allocation2 + $0x308] sm:$0xff]  ;;  %v4211_v50 = vcombine.low %v142_v38, %v150_v39  ;;  %v4213_v51 = vcombine.low %v143_v40, %v151_v41 }
  0x33   :  { %1610 = vmatpush1.bf16.msra.mxu0 %v4163_v26  ;;  %1651 = vmatpush1.bf16.msra.mxu1 %v4165_v27  ;;  %v166_v47 = vld [vmem:[#allocation2 + $0x340] sm:$0xff]  ;;  %v167_v49 = vld [vmem:[#allocation2 + $0x348] sm:$0xff] }
  0x34   :  { %1611 = vmatprep.subr.bf16.mxu0 %v4180_v28  ;;  %1652 = vmatprep.subr.bf16.mxu1 %v4182_v29  ;;  %v4228_v52 = vcombine.high %v158_v46, %v166_v47  ;;  %v4878_v53 = vld [vmem:[%s5068_s0] sm:$0xff]  ;;  %v4230_v54 = vcombine.high %v159_v48, %v167_v49  ;;  %v175_v58 = vld [vmem:[#allocation2 + $0x388] sm:$0xff]  ;;  %v4227_v60 = vcombine.low %v158_v46, %v166_v47 }
  0x35   :  { %v174_v55 = vld [vmem:[#allocation2 + $0x380] sm:$0xff]  ;;  %v4882_v57 = vcombine.high %v4878_v53, %v4878_v53  ;;  %v183_v59 = vld [vmem:[#allocation2 + $0x3c8] sm:$0xff]  ;;  %v4229_v61 = vcombine.low %v159_v48, %v167_v49 }
  0x36   :  { %v182_v56 = vld [vmem:[#allocation2 + $0x3c0] sm:$0xff]  ;;  %v4246_v63 = vcombine.high %v175_v58, %v183_v59  ;;  %v191_v2 = vld [vmem:[#allocation2 + $0x408] sm:$0xff]  ;;  %v4245_v5 = vcombine.low %v175_v58, %v183_v59 }
  0x37   :  { %1612 = vmatpush1.bf16.msra.mxu0 %v4179_v34  ;;  %1653 = vmatpush1.bf16.msra.mxu1 %v4181_v35  ;;  %v4244_v62 = vcombine.high %v174_v55, %v182_v56  ;;  %v190_v0 = vld [vmem:[#allocation2 + $0x400] sm:$0xff]  ;;  %v199_v3 = vld [vmem:[#allocation2 + $0x448] sm:$0xff]  ;;  %v4243_v4 = vcombine.low %v174_v55, %v182_v56 }
  0x38   :  { %1613 = vmatprep.subr.bf16.mxu0 %v4196_v36  ;;  %1654 = vmatprep.subr.bf16.mxu1 %v4198_v37  ;;  %v198_v1 = vld [vmem:[#allocation2 + $0x440] sm:$0xff]  ;;  %v4262_v7 = vcombine.high %v191_v2, %v199_v3  ;;  %v207_v10 = vld [vmem:[#allocation2 + $0x488] sm:$0xff]  ;;  %v4261_v13 = vcombine.low %v191_v2, %v199_v3  ;;  %v64_v2 = vld [vmem:[#allocation2 + $0x10] sm:$0xff] }
  0x39   :  { %1637 = vmatprep.mubr.bf16.mxu0 %v4882_v57  ;;  %1678 = vmatprep.mubr.bf16.mxu1 %v4882_v57  ;;  %v4260_v6 = vcombine.high %v190_v0, %v198_v1  ;;  %v206_v8 = vld [vmem:[#allocation2 + $0x480] sm:$0xff]  ;;  %v215_v11 = vld [vmem:[#allocation2 + $0x4c8] sm:$0xff]  ;;  %v4259_v12 = vcombine.low %v190_v0, %v198_v1  ;;  %v72_v3 = vld [vmem:[#allocation2 + $0x50] sm:$0xff] }
  0x3a   :  { %v214_v9 = vld [vmem:[#allocation2 + $0x4c0] sm:$0xff]  ;;  %v4278_v15 = vcombine.high %v207_v10, %v215_v11  ;;  %v223_v18 = vld [vmem:[#allocation2 + $0x508] sm:$0xff]  ;;  %v4277_v21 = vcombine.low %v207_v10, %v215_v11  ;;  %v80_v10 = vld [vmem:[#allocation2 + $0x90] sm:$0xff] }
  0x3b   :  { %1614 = vmatpush1.bf16.msra.mxu0 %v4195_v42  ;;  %1655 = vmatpush1.bf16.msra.mxu1 %v4197_v43  ;;  %v4276_v14 = vcombine.high %v206_v8, %v214_v9  ;;  %v222_v16 = vld [vmem:[#allocation2 + $0x500] sm:$0xff]  ;;  %v231_v19 = vld [vmem:[#allocation2 + $0x548] sm:$0xff]  ;;  %v4275_v20 = vcombine.low %v206_v8, %v214_v9  ;;  %v4136_v8 = vcombine.high %v64_v2, %v72_v3  ;;  %v88_v11 = vld [vmem:[#allocation2 + $0xd0] sm:$0xff] }
  0x3c   :  { %1615 = vmatprep.subr.bf16.mxu0 %v4212_v44  ;;  %1656 = vmatprep.subr.bf16.mxu1 %v4214_v45  ;;  %v230_v17 = vld [vmem:[#allocation2 + $0x540] sm:$0xff]  ;;  %v4294_v23 = vcombine.high %v223_v18, %v231_v19  ;;  %v239_v26 = vld [vmem:[#allocation2 + $0x588] sm:$0xff]  ;;  %v4293_v29 = vcombine.low %v223_v18, %v231_v19  ;;  %v96_v18 = vld [vmem:[#allocation2 + $0x110] sm:$0xff] }
  0x3d   :  { %v4292_v22 = vcombine.high %v222_v16, %v230_v17  ;;  %v238_v24 = vld [vmem:[#allocation2 + $0x580] sm:$0xff]  ;;  %v247_v27 = vld [vmem:[#allocation2 + $0x5c8] sm:$0xff]  ;;  %v4291_v28 = vcombine.low %v222_v16, %v230_v17  ;;  %v4152_v17 = vcombine.high %v80_v10, %v88_v11  ;;  %v104_v19 = vld [vmem:[#allocation2 + $0x150] sm:$0xff] }
  0x3e   :  { %v246_v25 = vld [vmem:[#allocation2 + $0x5c0] sm:$0xff]  ;;  %v4310_v31 = vcombine.high %v239_v26, %v247_v27  ;;  %v255_v34 = vld [vmem:[#allocation2 + $0x608] sm:$0xff]  ;;  %v4309_v37 = vcombine.low %v239_v26, %v247_v27  ;;  %v120_v26 = vld [vmem:[#allocation2 + $0x1d0] sm:$0xff] }
  0x3f   :  { %1616 = vmatpush1.bf16.msra.mxu0 %v4211_v50  ;;  %1657 = vmatpush1.bf16.msra.mxu1 %v4213_v51  ;;  %v4308_v30 = vcombine.high %v238_v24, %v246_v25  ;;  %v254_v32 = vld [vmem:[#allocation2 + $0x600] sm:$0xff]  ;;  %v263_v35 = vld [vmem:[#allocation2 + $0x648] sm:$0xff]  ;;  %v4307_v36 = vcombine.low %v238_v24, %v246_v25  ;;  %v4168_v24 = vcombine.high %v96_v18, %v104_v19  ;;  %v112_v25 = vld [vmem:[#allocation2 + $0x190] sm:$0xff] }
  0x40   :  { %1617 = vmatprep.subr.bf16.mxu0 %v4228_v52  ;;  %1658 = vmatprep.subr.bf16.mxu1 %v4230_v54  ;;  %v262_v33 = vld [vmem:[#allocation2 + $0x640] sm:$0xff]  ;;  %v4326_v39 = vcombine.high %v255_v34, %v263_v35  ;;  %v271_v42 = vld [vmem:[#allocation2 + $0x688] sm:$0xff]  ;;  %v4325_v45 = vcombine.low %v255_v34, %v263_v35  ;;  %v113_v27 = vld [vmem:[#allocation2 + $0x198] sm:$0xff] }
  0x41   :  { %v4324_v38 = vcombine.high %v254_v32, %v262_v33  ;;  %v270_v40 = vld [vmem:[#allocation2 + $0x680] sm:$0xff]  ;;  %v279_v43 = vld [vmem:[#allocation2 + $0x6c8] sm:$0xff]  ;;  %v4323_v44 = vcombine.low %v254_v32, %v262_v33  ;;  %v4184_v32 = vcombine.high %v112_v25, %v120_v26  ;;  %v128_v33 = vld [vmem:[#allocation2 + $0x210] sm:$0xff] }
  0x42   :  { %v278_v41 = vld [vmem:[#allocation2 + $0x6c0] sm:$0xff]  ;;  %v4342_v47 = vcombine.high %v271_v42, %v279_v43  ;;  %v287_v50 = vld [vmem:[#allocation2 + $0x708] sm:$0xff]  ;;  %v4341_v54 = vcombine.low %v271_v42, %v279_v43  ;;  %v136_v34 = vld [vmem:[#allocation2 + $0x250] sm:$0xff] }
  0x43   :  { %1618 = vmatpush1.bf16.msra.mxu0 %v4227_v60  ;;  %1659 = vmatpush1.bf16.msra.mxu1 %v4229_v61  ;;  %v4340_v46 = vcombine.high %v270_v40, %v278_v41  ;;  %v286_v48 = vld [vmem:[#allocation2 + $0x700] sm:$0xff]  ;;  %v295_v51 = vld [vmem:[#allocation2 + $0x748] sm:$0xff]  ;;  %v4339_v52 = vcombine.low %v270_v40, %v278_v41  ;;  %v129_v35 = vld [vmem:[#allocation2 + $0x218] sm:$0xff]  ;;  %v4200_v40 = vcombine.high %v128_v33, %v136_v34 }
  0x44   :  { %1619 = vmatprep.subr.bf16.mxu0 %v4244_v62  ;;  %1660 = vmatprep.subr.bf16.mxu1 %v4246_v63  ;;  %v294_v49 = vld [vmem:[#allocation2 + $0x740] sm:$0xff]  ;;  %v4358_v56 = vcombine.high %v287_v50, %v295_v51  ;;  %v303_v60 = vld [vmem:[#allocation2 + $0x788] sm:$0xff]  ;;  %v4357_v63 = vcombine.low %v287_v50, %v295_v51  ;;  %v144_v41 = vld [vmem:[#allocation2 + $0x290] sm:$0xff] }
  0x45   :  { %v4356_v55 = vcombine.high %v286_v48, %v294_v49  ;;  %v302_v58 = vld [vmem:[#allocation2 + $0x780] sm:$0xff]  ;;  %v311_v61 = vld [vmem:[#allocation2 + $0x7c8] sm:$0xff]  ;;  %v4355_v62 = vcombine.low %v286_v48, %v294_v49  ;;  %v152_v42 = vld [vmem:[#allocation2 + $0x2d0] sm:$0xff] }
  0x46   :  { %v310_v59 = vld [vmem:[#allocation2 + $0x7c0] sm:$0xff]  ;;  %v4374_v1 = vcombine.high %v303_v60, %v311_v61  ;;  %v145_v43 = vld [vmem:[#allocation2 + $0x298] sm:$0xff]  ;;  %v4216_v48 = vcombine.high %v144_v41, %v152_v42  ;;  %v160_v49 = vld [vmem:[#allocation2 + $0x310] sm:$0xff] }
  0x47   :  { %1620 = vmatpush1.bf16.msra.mxu0 %v4243_v4  ;;  %1661 = vmatpush1.bf16.msra.mxu1 %v4245_v5  ;;  %v4372_v0 = vcombine.high %v302_v58, %v310_v59  ;;  %v65_v4 = vld [vmem:[#allocation2 + $0x18] sm:$0xff]  ;;  %v168_v51 = vld [vmem:[#allocation2 + $0x350] sm:$0xff] }
  0x48   :  { %1621 = vmatprep.subr.bf16.mxu0 %v4260_v6  ;;  %1662 = vmatprep.subr.bf16.mxu1 %v4262_v7  ;;  %v73_v5 = vld [vmem:[#allocation2 + $0x58] sm:$0xff]  ;;  %v4371_v6 = vcombine.low %v302_v58, %v310_v59  ;;  %v4373_v7 = vcombine.low %v303_v60, %v311_v61  ;;  %v4232_v58 = vcombine.high %v160_v49, %v168_v51  ;;  %v176_v60 = vld [vmem:[#allocation2 + $0x390] sm:$0xff] }
  0x49   :  { %v4138_v9 = vcombine.high %v65_v4, %v73_v5  ;;  %v4137_v16 = vcombine.low %v65_v4, %v73_v5  ;;  %v184_v61 = vld [vmem:[#allocation2 + $0x3d0] sm:$0xff] }
  0x4a   :  { %v192_v4 = vld [vmem:[#allocation2 + $0x410] sm:$0xff] }
  0x4b   :  { %1622 = vmatpush1.bf16.msra.mxu0 %v4259_v12  ;;  %1663 = vmatpush1.bf16.msra.mxu1 %v4261_v13  ;;  %v4888_v12 = vcombine.low %v4878_v53, %v4878_v53  ;;  %v81_v13 = vld [vmem:[#allocation2 + $0x98] sm:$0xff]  ;;  %v4151_v53 = vcombine.low %v80_v10, %v88_v11  ;;  %v200_v5 = vld [vmem:[#allocation2 + $0x450] sm:$0xff] }
  0x4c   :  { %1623 = vmatprep.subr.bf16.mxu0 %v4276_v14  ;;  %1664 = vmatprep.subr.bf16.mxu1 %v4278_v15  ;;  %v89_v14 = vld [vmem:[#allocation2 + $0xd8] sm:$0xff]  ;;  %v4135_v15 = vcombine.low %v64_v2, %v72_v3  ;;  %v4248_v2 = vcombine.high %v176_v60, %v184_v61  ;;  %v4264_v10 = vcombine.high %v192_v4, %v200_v5 }
  0x4f   :  { %1624 = vmatpush1.bf16.msra.mxu0 %v4275_v20  ;;  %1665 = vmatpush1.bf16.msra.mxu1 %v4277_v21  ;;  %v97_v20 = vld [vmem:[#allocation2 + $0x118] sm:$0xff]  ;;  %v4154_v21 = vcombine.high %v81_v13, %v89_v14 }
  0x50   :  { %1625 = vmatprep.subr.bf16.mxu0 %v4292_v22  ;;  %1666 = vmatprep.subr.bf16.mxu1 %v4294_v23  ;;  %v105_v22 = vld [vmem:[#allocation2 + $0x158] sm:$0xff]  ;;  %v4153_v23 = vcombine.low %v81_v13, %v89_v14  ;;  %v208_v13 = vld [vmem:[#allocation2 + $0x490] sm:$0xff] }
  0x51   :  { %v216_v14 = vld [vmem:[#allocation2 + $0x4d0] sm:$0xff] }
  0x53   :  { %1626 = vmatpush1.bf16.msra.mxu0 %v4291_v28  ;;  %1667 = vmatpush1.bf16.msra.mxu1 %v4293_v29  ;;  %v4170_v28 = vcombine.high %v97_v20, %v105_v22  ;;  %v121_v29 = vld [vmem:[#allocation2 + $0x1d8] sm:$0xff] }
  0x54   :  { %1627 = vmatprep.subr.bf16.mxu0 %v4308_v30  ;;  %1668 = vmatprep.subr.bf16.mxu1 %v4310_v31  ;;  %v4167_v30 = vcombine.low %v96_v18, %v104_v19  ;;  %v4169_v31 = vcombine.low %v97_v20, %v105_v22  ;;  %v4280_v19 = vcombine.high %v208_v13, %v216_v14  ;;  %v232_v22 = vld [vmem:[#allocation2 + $0x550] sm:$0xff] }
  0x57   :  { %1628 = vmatpush1.bf16.msra.mxu0 %v4307_v36  ;;  %1669 = vmatpush1.bf16.msra.mxu1 %v4309_v37  ;;  %v4186_v36 = vcombine.high %v113_v27, %v121_v29  ;;  %v137_v37 = vld [vmem:[#allocation2 + $0x258] sm:$0xff] }
  0x58   :  { %1629 = vmatprep.subr.bf16.mxu0 %v4324_v38  ;;  %1670 = vmatprep.subr.bf16.mxu1 %v4326_v39  ;;  %v4183_v38 = vcombine.low %v112_v25, %v120_v26  ;;  %v4185_v39 = vcombine.low %v113_v27, %v121_v29  ;;  %v248_v29 = vld [vmem:[#allocation2 + $0x5d0] sm:$0xff] }
  0x5b   :  { %1630 = vmatpush1.bf16.msra.mxu0 %v4323_v44  ;;  %1671 = vmatpush1.bf16.msra.mxu1 %v4325_v45  ;;  %v4202_v44 = vcombine.high %v129_v35, %v137_v37  ;;  %v153_v45 = vld [vmem:[#allocation2 + $0x2d8] sm:$0xff] }
  0x5c   :  { %1631 = vmatprep.subr.bf16.mxu0 %v4340_v46  ;;  %1672 = vmatprep.subr.bf16.mxu1 %v4342_v47  ;;  %v4199_v46 = vcombine.low %v128_v33, %v136_v34  ;;  %v4201_v47 = vcombine.low %v129_v35, %v137_v37  ;;  %v4218_v50 = vcombine.high %v145_v43, %v153_v45  ;;  %v264_v37 = vld [vmem:[#allocation2 + $0x650] sm:$0xff] }
  0x5f   :  { %1632 = vmatpush1.bf16.msra.mxu0 %v4339_v52  ;;  %1673 = vmatpush1.bf16.msra.mxu1 %v4341_v54  ;;  %v161_v52 = vld [vmem:[#allocation2 + $0x318] sm:$0xff] }
  0x60   :  { %1633 = vmatprep.subr.bf16.mxu0 %v4356_v55  ;;  %1674 = vmatprep.subr.bf16.mxu1 %v4358_v56  ;;  %v169_v54 = vld [vmem:[#allocation2 + $0x358] sm:$0xff]  ;;  %v4215_v55 = vcombine.low %v144_v41, %v152_v42  ;;  %v4217_v56 = vcombine.low %v145_v43, %v153_v45  ;;  %v280_v45 = vld [vmem:[#allocation2 + $0x6d0] sm:$0xff] }
  0x61   :  { %v4234_v59 = vcombine.high %v161_v52, %v169_v54 }
  0x63   :  { %1634 = vmatpush1.bf16.msra.mxu0 %v4355_v62  ;;  %1675 = vmatpush1.bf16.msra.mxu1 %v4357_v63  ;;  %v177_v62 = vld [vmem:[#allocation2 + $0x398] sm:$0xff] }
  0x64   :  { %1635 = vmatprep.subr.bf16.mxu0 %v4372_v0  ;;  %1676 = vmatprep.subr.bf16.mxu1 %v4374_v1  ;;  %v185_v63 = vld [vmem:[#allocation2 + $0x3d8] sm:$0xff]  ;;  %v4231_v0 = vcombine.low %v160_v49, %v168_v51  ;;  %v4233_v1 = vcombine.low %v161_v52, %v169_v54  ;;  %v288_v52 = vld [vmem:[#allocation2 + $0x710] sm:$0xff] }
  0x65   :  { %v4250_v3 = vcombine.high %v177_v62, %v185_v63  ;;  %v296_v54 = vld [vmem:[#allocation2 + $0x750] sm:$0xff] }
  0x67   :  { %1636 = vmatpush1.bf16.msra.mxu0 %v4371_v6  ;;  %1677 = vmatpush1.bf16.msra.mxu1 %v4373_v7  ;;  %v193_v6 = vld [vmem:[#allocation2 + $0x418] sm:$0xff] }
  0x68   :  { %1687 = vmatprep.subr.bf16.mxu0 %v4136_v8  ;;  %1728 = vmatprep.subr.bf16.mxu1 %v4138_v9  ;;  %v201_v7 = vld [vmem:[#allocation2 + $0x458] sm:$0xff]  ;;  %v4247_v8 = vcombine.low %v176_v60, %v184_v61  ;;  %v4249_v9 = vcombine.low %v177_v62, %v185_v63  ;;  %v4360_v60 = vcombine.high %v288_v52, %v296_v54  ;;  %v304_v62 = vld [vmem:[#allocation2 + $0x790] sm:$0xff] }
  0x69   :  { %v4266_v11 = vcombine.high %v193_v6, %v201_v7  ;;  %v4265_v18 = vcombine.low %v193_v6, %v201_v7  ;;  %v312_v63 = vld [vmem:[#allocation2 + $0x7d0] sm:$0xff]  ;;  %v66_v6 = vld [vmem:[#allocation2 + $0x20] sm:$0xff] }
  0x6a   :  { %1638 = vmatmul.mubr.bf16.vlgmr.msra.gmra.mrb[0].mxu0 %v4888_v12  ;;  %1679 = vmatmul.mubr.bf16.vlgmr.msra.gmra.mrb[0].mxu1 %v4888_v12  ;;  %v74_v7 = vld [vmem:[#allocation2 + $0x60] sm:$0xff] }
  0x6b   :  { %1688 = vmatpush1.bf16.msra.mxu0 %v4135_v15  ;;  %1729 = vmatpush1.bf16.msra.mxu1 %v4137_v16  ;;  %v209_v15 = vld [vmem:[#allocation2 + $0x498] sm:$0xff] }
  0x6c   :  { %1689 = vmatprep.subr.bf16.mxu0 %v4152_v17  ;;  %1730 = vmatprep.subr.bf16.mxu1 %v4154_v21  ;;  %v217_v16 = vld [vmem:[#allocation2 + $0x4d8] sm:$0xff]  ;;  %v4263_v17 = vcombine.low %v192_v4, %v200_v5  ;;  %v224_v21 = vld [vmem:[#allocation2 + $0x510] sm:$0xff]  ;;  %v4376_v4 = vcombine.high %v304_v62, %v312_v63 }
  0x6d   :  { %1719 = vmatprep.mubr.bf16.mxu0 %v4882_v57  ;;  %1760 = vmatprep.mubr.bf16.mxu1 %v4882_v57  ;;  %v4282_v20 = vcombine.high %v209_v15, %v217_v16  ;;  %v4281_v25 = vcombine.low %v209_v15, %v217_v16  ;;  %v4296_v26 = vcombine.high %v224_v21, %v232_v22  ;;  %v82_v15 = vld [vmem:[#allocation2 + $0xa0] sm:$0xff] }
  0x6e   :  { %v90_v16 = vld [vmem:[#allocation2 + $0xe0] sm:$0xff] }
  0x6f   :  { %1690 = vmatpush1.bf16.msra.mxu0 %v4151_v53  ;;  %1731 = vmatpush1.bf16.msra.mxu1 %v4153_v23  ;;  %v225_v53 = vld [vmem:[#allocation2 + $0x518] sm:$0xff] }
  0x70   :  { %1691 = vmatprep.subr.bf16.mxu0 %v4168_v24  ;;  %1732 = vmatprep.subr.bf16.mxu1 %v4170_v28  ;;  %v233_v23 = vld [vmem:[#allocation2 + $0x558] sm:$0xff]  ;;  %v4279_v24 = vcombine.low %v208_v13, %v216_v14  ;;  %v240_v28 = vld [vmem:[#allocation2 + $0x590] sm:$0xff]  ;;  %v4140_v13 = vcombine.high %v66_v6, %v74_v7 }
  0x71   :  { %v4298_v27 = vcombine.high %v225_v53, %v233_v23  ;;  %v4297_v33 = vcombine.low %v225_v53, %v233_v23  ;;  %v4312_v34 = vcombine.high %v240_v28, %v248_v29  ;;  %v98_v53 = vld [vmem:[#allocation2 + $0x120] sm:$0xff] }
  0x72   :  { %v106_v23 = vld [vmem:[#allocation2 + $0x160] sm:$0xff] }
  0x73   :  { %1692 = vmatpush1.bf16.msra.mxu0 %v4167_v30  ;;  %1733 = vmatpush1.bf16.msra.mxu1 %v4169_v31  ;;  %v241_v30 = vld [vmem:[#allocation2 + $0x598] sm:$0xff] }
  0x74   :  { %1693 = vmatprep.subr.bf16.mxu0 %v4184_v32  ;;  %1734 = vmatprep.subr.bf16.mxu1 %v4186_v36  ;;  %v249_v31 = vld [vmem:[#allocation2 + $0x5d8] sm:$0xff]  ;;  %v4295_v32 = vcombine.low %v224_v21, %v232_v22  ;;  %v256_v36 = vld [vmem:[#allocation2 + $0x610] sm:$0xff]  ;;  %v4156_v21 = vcombine.high %v82_v15, %v90_v16 }
  0x75   :  { %v4314_v35 = vcombine.high %v241_v30, %v249_v31  ;;  %v4313_v41 = vcombine.low %v241_v30, %v249_v31  ;;  %v4328_v42 = vcombine.high %v256_v36, %v264_v37  ;;  %v114_v30 = vld [vmem:[#allocation2 + $0x1a0] sm:$0xff] }
  0x76   :  { %v122_v31 = vld [vmem:[#allocation2 + $0x1e0] sm:$0xff] }
  0x77   :  { %1694 = vmatpush1.bf16.msra.mxu0 %v4183_v38  ;;  %1735 = vmatpush1.bf16.msra.mxu1 %v4185_v39  ;;  %v257_v38 = vld [vmem:[#allocation2 + $0x618] sm:$0xff] }
  0x78   :  { %1695 = vmatprep.subr.bf16.mxu0 %v4200_v40  ;;  %1736 = vmatprep.subr.bf16.mxu1 %v4202_v44  ;;  %v265_v39 = vld [vmem:[#allocation2 + $0x658] sm:$0xff]  ;;  %v4311_v40 = vcombine.low %v240_v28, %v248_v29  ;;  %v272_v44 = vld [vmem:[#allocation2 + $0x690] sm:$0xff]  ;;  %v4172_v28 = vcombine.high %v98_v53, %v106_v23 }
  0x79   :  { %v4330_v43 = vcombine.high %v257_v38, %v265_v39  ;;  %v4329_v49 = vcombine.low %v257_v38, %v265_v39  ;;  %v130_v38 = vld [vmem:[#allocation2 + $0x220] sm:$0xff] }
  0x7a   :  { %v138_v39 = vld [vmem:[#allocation2 + $0x260] sm:$0xff] }
  0x7b   :  { %1696 = vmatpush1.bf16.msra.mxu0 %v4199_v46  ;;  %1737 = vmatpush1.bf16.msra.mxu1 %v4201_v47  ;;  %v273_v46 = vld [vmem:[#allocation2 + $0x698] sm:$0xff] }
  0x7c   :  { %1697 = vmatprep.subr.bf16.mxu0 %v4216_v48  ;;  %1738 = vmatprep.subr.bf16.mxu1 %v4218_v50  ;;  %v281_v47 = vld [vmem:[#allocation2 + $0x6d8] sm:$0xff]  ;;  %v4327_v48 = vcombine.low %v256_v36, %v264_v37  ;;  %v4344_v50 = vcombine.high %v272_v44, %v280_v45  ;;  %v4188_v36 = vcombine.high %v114_v30, %v122_v31 }
  0x7d   :  { %v4346_v51 = vcombine.high %v273_v46, %v281_v47 }
  0x7f   :  { %1698 = vmatpush1.bf16.msra.mxu0 %v4215_v55  ;;  %1739 = vmatpush1.bf16.msra.mxu1 %v4217_v56  ;;  %v289_v55 = vld [vmem:[#allocation2 + $0x718] sm:$0xff] }
  0x80   :  { %1699 = vmatprep.subr.bf16.mxu0 %v4232_v58  ;;  %1740 = vmatprep.subr.bf16.mxu1 %v4234_v59  ;;  %v297_v56 = vld [vmem:[#allocation2 + $0x758] sm:$0xff]  ;;  %v4343_v58 = vcombine.low %v272_v44, %v280_v45  ;;  %v4345_v59 = vcombine.low %v273_v46, %v281_v47  ;;  %v4204_v44 = vcombine.high %v130_v38, %v138_v39  ;;  %v146_v46 = vld [vmem:[#allocation2 + $0x2a0] sm:$0xff] }
  0x81   :  { %v4362_v61 = vcombine.high %v289_v55, %v297_v56  ;;  %v154_v47 = vld [vmem:[#allocation2 + $0x2e0] sm:$0xff] }
  0x83   :  { %1700 = vmatpush1.bf16.msra.mxu0 %v4231_v0  ;;  %1741 = vmatpush1.bf16.msra.mxu1 %v4233_v1  ;;  %v305_v0 = vld [vmem:[#allocation2 + $0x798] sm:$0xff] }
  0x84   :  { %1701 = vmatprep.subr.bf16.mxu0 %v4248_v2  ;;  %1742 = vmatprep.subr.bf16.mxu1 %v4250_v3  ;;  %v313_v1 = vld [vmem:[#allocation2 + $0x7d8] sm:$0xff]  ;;  %v4359_v2 = vcombine.low %v288_v52, %v296_v54  ;;  %v4361_v3 = vcombine.low %v289_v55, %v297_v56  ;;  %v4220_v52 = vcombine.high %v146_v46, %v154_v47  ;;  %v162_v55 = vld [vmem:[#allocation2 + $0x320] sm:$0xff] }
  0x85   :  { %v4378_v5 = vcombine.high %v305_v0, %v313_v1  ;;  %v170_v56 = vld [vmem:[#allocation2 + $0x360] sm:$0xff] }
  0x87   :  { %1702 = vmatpush1.bf16.msra.mxu0 %v4247_v8  ;;  %1743 = vmatpush1.bf16.msra.mxu1 %v4249_v9  ;;  %v67_v8 = vld [vmem:[#allocation2 + $0x28] sm:$0xff] }
  0x88   :  { %1703 = vmatprep.subr.bf16.mxu0 %v4264_v10  ;;  %1744 = vmatprep.subr.bf16.mxu1 %v4266_v11  ;;  %v75_v9 = vld [vmem:[#allocation2 + $0x68] sm:$0xff]  ;;  %v4375_v10 = vcombine.low %v304_v62, %v312_v63  ;;  %v4377_v11 = vcombine.low %v305_v0, %v313_v1  ;;  %v4236_v62 = vcombine.high %v162_v55, %v170_v56  ;;  %v178_v0 = vld [vmem:[#allocation2 + $0x3a0] sm:$0xff] }
  0x89   :  { %v4142_v14 = vcombine.high %v67_v8, %v75_v9  ;;  %v186_v1 = vld [vmem:[#allocation2 + $0x3e0] sm:$0xff] }
  0x8b   :  { %1704 = vmatpush1.bf16.msra.mxu0 %v4263_v17  ;;  %1745 = vmatpush1.bf16.msra.mxu1 %v4265_v18  ;;  %v83_v17 = vld [vmem:[#allocation2 + $0xa8] sm:$0xff] }
  0x8c   :  { %1705 = vmatprep.subr.bf16.mxu0 %v4280_v19  ;;  %1746 = vmatprep.subr.bf16.mxu1 %v4282_v20  ;;  %v91_v18 = vld [vmem:[#allocation2 + $0xe8] sm:$0xff]  ;;  %v4139_v19 = vcombine.low %v66_v6, %v74_v7  ;;  %v4141_v20 = vcombine.low %v67_v8, %v75_v9  ;;  %v4252_v6 = vcombine.high %v178_v0, %v186_v1  ;;  %v194_v8 = vld [vmem:[#allocation2 + $0x420] sm:$0xff] }
  0x8d   :  { %v4158_v22 = vcombine.high %v83_v17, %v91_v18  ;;  %v202_v9 = vld [vmem:[#allocation2 + $0x460] sm:$0xff] }
  0x8f   :  { %1706 = vmatpush1.bf16.msra.mxu0 %v4279_v24  ;;  %1747 = vmatpush1.bf16.msra.mxu1 %v4281_v25  ;;  %v99_v24 = vld [vmem:[#allocation2 + $0x128] sm:$0xff] }
  0x90   :  { %1707 = vmatprep.subr.bf16.mxu0 %v4296_v26  ;;  %1748 = vmatprep.subr.bf16.mxu1 %v4298_v27  ;;  %v107_v25 = vld [vmem:[#allocation2 + $0x168] sm:$0xff]  ;;  %v4155_v26 = vcombine.low %v82_v15, %v90_v16  ;;  %v4157_v27 = vcombine.low %v83_v17, %v91_v18  ;;  %v4268_v15 = vcombine.high %v194_v8, %v202_v9  ;;  %v210_v17 = vld [vmem:[#allocation2 + $0x4a0] sm:$0xff] }
  0x91   :  { %v4174_v29 = vcombine.high %v99_v24, %v107_v25  ;;  %v218_v18 = vld [vmem:[#allocation2 + $0x4e0] sm:$0xff] }
  0x93   :  { %1708 = vmatpush1.bf16.msra.mxu0 %v4295_v32  ;;  %1749 = vmatpush1.bf16.msra.mxu1 %v4297_v33  ;;  %v115_v32 = vld [vmem:[#allocation2 + $0x1a8] sm:$0xff] }
  0x94   :  { %1709 = vmatprep.subr.bf16.mxu0 %v4312_v34  ;;  %1750 = vmatprep.subr.bf16.mxu1 %v4314_v35  ;;  %v123_v33 = vld [vmem:[#allocation2 + $0x1e8] sm:$0xff]  ;;  %v4171_v34 = vcombine.low %v98_v53, %v106_v23  ;;  %v4173_v35 = vcombine.low %v99_v24, %v107_v25  ;;  %v4284_v53 = vcombine.high %v210_v17, %v218_v18  ;;  %v226_v24 = vld [vmem:[#allocation2 + $0x520] sm:$0xff] }
  0x95   :  { %v4190_v37 = vcombine.high %v115_v32, %v123_v33  ;;  %v234_v25 = vld [vmem:[#allocation2 + $0x560] sm:$0xff] }
  0x97   :  { %1710 = vmatpush1.bf16.msra.mxu0 %v4311_v40  ;;  %1751 = vmatpush1.bf16.msra.mxu1 %v4313_v41  ;;  %v131_v40 = vld [vmem:[#allocation2 + $0x228] sm:$0xff] }
  0x98   :  { %1711 = vmatprep.subr.bf16.mxu0 %v4328_v42  ;;  %1752 = vmatprep.subr.bf16.mxu1 %v4330_v43  ;;  %v139_v41 = vld [vmem:[#allocation2 + $0x268] sm:$0xff]  ;;  %v4187_v42 = vcombine.low %v114_v30, %v122_v31  ;;  %v4189_v43 = vcombine.low %v115_v32, %v123_v33  ;;  %v4300_v30 = vcombine.high %v226_v24, %v234_v25  ;;  %v242_v32 = vld [vmem:[#allocation2 + $0x5a0] sm:$0xff] }
  0x99   :  { %v4206_v45 = vcombine.high %v131_v40, %v139_v41  ;;  %v250_v33 = vld [vmem:[#allocation2 + $0x5e0] sm:$0xff] }
  0x9b   :  { %1712 = vmatpush1.bf16.msra.mxu0 %v4327_v48  ;;  %1753 = vmatpush1.bf16.msra.mxu1 %v4329_v49  ;;  %v147_v48 = vld [vmem:[#allocation2 + $0x2a8] sm:$0xff] }
  0x9c   :  { %1713 = vmatprep.subr.bf16.mxu0 %v4344_v50  ;;  %1754 = vmatprep.subr.bf16.mxu1 %v4346_v51  ;;  %v155_v49 = vld [vmem:[#allocation2 + $0x2e8] sm:$0xff]  ;;  %v4203_v50 = vcombine.low %v130_v38, %v138_v39  ;;  %v4205_v51 = vcombine.low %v131_v40, %v139_v41  ;;  %v4316_v38 = vcombine.high %v242_v32, %v250_v33  ;;  %v258_v40 = vld [vmem:[#allocation2 + $0x620] sm:$0xff] }
  0x9d   :  { %v4222_v54 = vcombine.high %v147_v48, %v155_v49  ;;  %v266_v41 = vld [vmem:[#allocation2 + $0x660] sm:$0xff] }
  0x9f   :  { %1714 = vmatpush1.bf16.msra.mxu0 %v4343_v58  ;;  %1755 = vmatpush1.bf16.msra.mxu1 %v4345_v59  ;;  %v163_v58 = vld [vmem:[#allocation2 + $0x328] sm:$0xff] }
  0xa0   :  { %1715 = vmatprep.subr.bf16.mxu0 %v4360_v60  ;;  %1756 = vmatprep.subr.bf16.mxu1 %v4362_v61  ;;  %v171_v59 = vld [vmem:[#allocation2 + $0x368] sm:$0xff]  ;;  %v4219_v60 = vcombine.low %v146_v46, %v154_v47  ;;  %v4221_v61 = vcombine.low %v147_v48, %v155_v49  ;;  %v4332_v46 = vcombine.high %v258_v40, %v266_v41  ;;  %v274_v48 = vld [vmem:[#allocation2 + $0x6a0] sm:$0xff] }
  0xa1   :  { %v4238_v63 = vcombine.high %v163_v58, %v171_v59  ;;  %v282_v49 = vld [vmem:[#allocation2 + $0x6e0] sm:$0xff] }
  0xa3   :  { %1716 = vmatpush1.bf16.msra.mxu0 %v4359_v2  ;;  %1757 = vmatpush1.bf16.msra.mxu1 %v4361_v3  ;;  %v179_v2 = vld [vmem:[#allocation2 + $0x3a8] sm:$0xff] }
  0xa4   :  { %1717 = vmatprep.subr.bf16.mxu0 %v4376_v4  ;;  %1758 = vmatprep.subr.bf16.mxu1 %v4378_v5  ;;  %v187_v3 = vld [vmem:[#allocation2 + $0x3e8] sm:$0xff]  ;;  %v4235_v4 = vcombine.low %v162_v55, %v170_v56  ;;  %v4237_v5 = vcombine.low %v163_v58, %v171_v59  ;;  %v4348_v55 = vcombine.high %v274_v48, %v282_v49  ;;  %v290_v58 = vld [vmem:[#allocation2 + $0x720] sm:$0xff] }
  0xa5   :  { %v4254_v7 = vcombine.high %v179_v2, %v187_v3  ;;  %v298_v59 = vld [vmem:[#allocation2 + $0x760] sm:$0xff] }
  0xa7   :  { %1718 = vmatpush1.bf16.msra.mxu0 %v4375_v10  ;;  %1759 = vmatpush1.bf16.msra.mxu1 %v4377_v11  ;;  %v195_v10 = vld [vmem:[#allocation2 + $0x428] sm:$0xff] }
  0xa8   :  { %1769 = vmatprep.subr.bf16.mxu0 %v4140_v13  ;;  %1810 = vmatprep.subr.bf16.mxu1 %v4142_v14  ;;  %v203_v11 = vld [vmem:[#allocation2 + $0x468] sm:$0xff]  ;;  %v4251_v13 = vcombine.low %v178_v0, %v186_v1  ;;  %v4253_v14 = vcombine.low %v179_v2, %v187_v3  ;;  %v4364_v0 = vcombine.high %v290_v58, %v298_v59  ;;  %v306_v2 = vld [vmem:[#allocation2 + $0x7a0] sm:$0xff] }
  0xa9   :  { %v4270_v16 = vcombine.high %v195_v10, %v203_v11  ;;  %v314_v3 = vld [vmem:[#allocation2 + $0x7e0] sm:$0xff] }
  0xaa   :  { %1720 = vmatmul.mubr.bf16.vlgmr.msra.gmra.mrb[4].mxu0 %v4888_v12  ;;  %1761 = vmatmul.mubr.bf16.vlgmr.msra.gmra.mrb[4].mxu1 %v4888_v12 }
  0xab   :  { %1770 = vmatpush1.bf16.msra.mxu0 %v4139_v19  ;;  %1811 = vmatpush1.bf16.msra.mxu1 %v4141_v20  ;;  %v211_v19 = vld [vmem:[#allocation2 + $0x4a8] sm:$0xff] }
  0xac   :  { %1771 = vmatprep.subr.bf16.mxu0 %v4156_v21  ;;  %1812 = vmatprep.subr.bf16.mxu1 %v4158_v22  ;;  %v219_v20 = vld [vmem:[#allocation2 + $0x4e8] sm:$0xff]  ;;  %v4267_v21 = vcombine.low %v194_v8, %v202_v9  ;;  %v4269_v22 = vcombine.low %v195_v10, %v203_v11  ;;  %v4380_v8 = vcombine.high %v306_v2, %v314_v3  ;;  %v68_v10 = vld [vmem:[#allocation2 + $0x30] sm:$0xff] }
  0xad   :  { %1801 = vmatprep.mubr.bf16.mxu0 %v4882_v57  ;;  %1842 = vmatprep.mubr.bf16.mxu1 %v4882_v57  ;;  %v4286_v23 = vcombine.high %v211_v19, %v219_v20  ;;  %v76_v11 = vld [vmem:[#allocation2 + $0x70] sm:$0xff] }
  0xaf   :  { %1772 = vmatpush1.bf16.msra.mxu0 %v4155_v26  ;;  %1813 = vmatpush1.bf16.msra.mxu1 %v4157_v27  ;;  %v227_v26 = vld [vmem:[#allocation2 + $0x528] sm:$0xff] }
  0xb0   :  { %1773 = vmatprep.subr.bf16.mxu0 %v4172_v28  ;;  %1814 = vmatprep.subr.bf16.mxu1 %v4174_v29  ;;  %v235_v27 = vld [vmem:[#allocation2 + $0x568] sm:$0xff]  ;;  %v4283_v28 = vcombine.low %v210_v17, %v218_v18  ;;  %v4285_v29 = vcombine.low %v211_v19, %v219_v20  ;;  %v4144_v17 = vcombine.high %v68_v10, %v76_v11  ;;  %v84_v19 = vld [vmem:[#allocation2 + $0xb0] sm:$0xff] }
  0xb1   :  { %v4302_v31 = vcombine.high %v227_v26, %v235_v27  ;;  %v92_v20 = vld [vmem:[#allocation2 + $0xf0] sm:$0xff] }
  0xb3   :  { %1774 = vmatpush1.bf16.msra.mxu0 %v4171_v34  ;;  %1815 = vmatpush1.bf16.msra.mxu1 %v4173_v35  ;;  %v243_v34 = vld [vmem:[#allocation2 + $0x5a8] sm:$0xff] }
  0xb4   :  { %1775 = vmatprep.subr.bf16.mxu0 %v4188_v36  ;;  %1816 = vmatprep.subr.bf16.mxu1 %v4190_v37  ;;  %v251_v35 = vld [vmem:[#allocation2 + $0x5e8] sm:$0xff]  ;;  %v4299_v36 = vcombine.low %v226_v24, %v234_v25  ;;  %v4301_v37 = vcombine.low %v227_v26, %v235_v27  ;;  %v4160_v24 = vcombine.high %v84_v19, %v92_v20  ;;  %v100_v26 = vld [vmem:[#allocation2 + $0x130] sm:$0xff] }
  0xb5   :  { %v4318_v39 = vcombine.high %v243_v34, %v251_v35  ;;  %v108_v27 = vld [vmem:[#allocation2 + $0x170] sm:$0xff] }
  0xb7   :  { %1776 = vmatpush1.bf16.msra.mxu0 %v4187_v42  ;;  %1817 = vmatpush1.bf16.msra.mxu1 %v4189_v43  ;;  %v259_v42 = vld [vmem:[#allocation2 + $0x628] sm:$0xff] }
  0xb8   :  { %1777 = vmatprep.subr.bf16.mxu0 %v4204_v44  ;;  %1818 = vmatprep.subr.bf16.mxu1 %v4206_v45  ;;  %v267_v43 = vld [vmem:[#allocation2 + $0x668] sm:$0xff]  ;;  %v4315_v44 = vcombine.low %v242_v32, %v250_v33  ;;  %v4317_v45 = vcombine.low %v243_v34, %v251_v35  ;;  %v4176_v32 = vcombine.high %v100_v26, %v108_v27  ;;  %v116_v34 = vld [vmem:[#allocation2 + $0x1b0] sm:$0xff] }
  0xb9   :  { %v4334_v47 = vcombine.high %v259_v42, %v267_v43  ;;  %v124_v35 = vld [vmem:[#allocation2 + $0x1f0] sm:$0xff] }
  0xbb   :  { %1778 = vmatpush1.bf16.msra.mxu0 %v4203_v50  ;;  %1819 = vmatpush1.bf16.msra.mxu1 %v4205_v51  ;;  %v275_v50 = vld [vmem:[#allocation2 + $0x6a8] sm:$0xff] }
  0xbc   :  { %1779 = vmatprep.subr.bf16.mxu0 %v4220_v52  ;;  %1820 = vmatprep.subr.bf16.mxu1 %v4222_v54  ;;  %v283_v51 = vld [vmem:[#allocation2 + $0x6e8] sm:$0xff]  ;;  %v4331_v52 = vcombine.low %v258_v40, %v266_v41  ;;  %v4333_v54 = vcombine.low %v259_v42, %v267_v43  ;;  %v4192_v40 = vcombine.high %v116_v34, %v124_v35  ;;  %v132_v42 = vld [vmem:[#allocation2 + $0x230] sm:$0xff] }
  0xbd   :  { %v4350_v56 = vcombine.high %v275_v50, %v283_v51  ;;  %v140_v43 = vld [vmem:[#allocation2 + $0x270] sm:$0xff] }
  0xbf   :  { %1780 = vmatpush1.bf16.msra.mxu0 %v4219_v60  ;;  %1821 = vmatpush1.bf16.msra.mxu1 %v4221_v61  ;;  %v291_v60 = vld [vmem:[#allocation2 + $0x728] sm:$0xff] }
  0xc0   :  { %1781 = vmatprep.subr.bf16.mxu0 %v4236_v62  ;;  %1822 = vmatprep.subr.bf16.mxu1 %v4238_v63  ;;  %v299_v61 = vld [vmem:[#allocation2 + $0x768] sm:$0xff]  ;;  %v4347_v62 = vcombine.low %v274_v48, %v282_v49  ;;  %v4349_v63 = vcombine.low %v275_v50, %v283_v51  ;;  %v4208_v48 = vcombine.high %v132_v42, %v140_v43  ;;  %v148_v49 = vld [vmem:[#allocation2 + $0x2b0] sm:$0xff]  ;;  %v149_v51 = vld [vmem:[#allocation2 + $0x2b8] sm:$0xff] }
  0xc1   :  { %v4366_v1 = vcombine.high %v291_v60, %v299_v61  ;;  %v156_v50 = vld [vmem:[#allocation2 + $0x2f0] sm:$0xff] }
  0xc3   :  { %1782 = vmatpush1.bf16.msra.mxu0 %v4235_v4  ;;  %1823 = vmatpush1.bf16.msra.mxu1 %v4237_v5  ;;  %v307_v4 = vld [vmem:[#allocation2 + $0x7a8] sm:$0xff] }
  0xc4   :  { %1783 = vmatprep.subr.bf16.mxu0 %v4252_v6  ;;  %1824 = vmatprep.subr.bf16.mxu1 %v4254_v7  ;;  %v315_v5 = vld [vmem:[#allocation2 + $0x7e8] sm:$0xff]  ;;  %v4363_v6 = vcombine.low %v290_v58, %v298_v59  ;;  %v4365_v7 = vcombine.low %v291_v60, %v299_v61  ;;  %v164_v59 = vld [vmem:[#allocation2 + $0x330] sm:$0xff]  ;;  %v165_v61 = vld [vmem:[#allocation2 + $0x338] sm:$0xff] }
  0xc5   :  { %v4382_v9 = vcombine.high %v307_v4, %v315_v5  ;;  %v172_v60 = vld [vmem:[#allocation2 + $0x370] sm:$0xff] }
  0xc7   :  { %1784 = vmatpush1.bf16.msra.mxu0 %v4251_v13  ;;  %1825 = vmatpush1.bf16.msra.mxu1 %v4253_v14  ;;  %v69_v13 = vld [vmem:[#allocation2 + $0x38] sm:$0xff] }
  0xc8   :  { %1785 = vmatprep.subr.bf16.mxu0 %v4268_v15  ;;  %1826 = vmatprep.subr.bf16.mxu1 %v4270_v16  ;;  %v77_v14 = vld [vmem:[#allocation2 + $0x78] sm:$0xff]  ;;  %v4379_v15 = vcombine.low %v306_v2, %v314_v3  ;;  %v4381_v16 = vcombine.low %v307_v4, %v315_v5  ;;  %v180_v3 = vld [vmem:[#allocation2 + $0x3b0] sm:$0xff] }
  0xc9   :  { %v4146_v18 = vcombine.high %v69_v13, %v77_v14  ;;  %v188_v4 = vld [vmem:[#allocation2 + $0x3f0] sm:$0xff]  ;;  %v181_v5 = vld [vmem:[#allocation2 + $0x3b8] sm:$0xff] }
  0xcb   :  { %1786 = vmatpush1.bf16.msra.mxu0 %v4267_v21  ;;  %1827 = vmatpush1.bf16.msra.mxu1 %v4269_v22  ;;  %v85_v21 = vld [vmem:[#allocation2 + $0xb8] sm:$0xff] }
  0xcc   :  { %1787 = vmatprep.subr.bf16.mxu0 %v4284_v53  ;;  %1828 = vmatprep.subr.bf16.mxu1 %v4286_v23  ;;  %v93_v22 = vld [vmem:[#allocation2 + $0xf8] sm:$0xff]  ;;  %v4143_v53 = vcombine.low %v68_v10, %v76_v11  ;;  %v4145_v23 = vcombine.low %v69_v13, %v77_v14  ;;  %v196_v11 = vld [vmem:[#allocation2 + $0x430] sm:$0xff] }
  0xcd   :  { %v4162_v25 = vcombine.high %v85_v21, %v93_v22  ;;  %v204_v13 = vld [vmem:[#allocation2 + $0x470] sm:$0xff]  ;;  %v197_v14 = vld [vmem:[#allocation2 + $0x438] sm:$0xff] }
  0xcf   :  { %1788 = vmatpush1.bf16.msra.mxu0 %v4283_v28  ;;  %1829 = vmatpush1.bf16.msra.mxu1 %v4285_v29  ;;  %v101_v28 = vld [vmem:[#allocation2 + $0x138] sm:$0xff] }
  0xd0   :  { %1789 = vmatprep.subr.bf16.mxu0 %v4300_v30  ;;  %1830 = vmatprep.subr.bf16.mxu1 %v4302_v31  ;;  %v109_v29 = vld [vmem:[#allocation2 + $0x178] sm:$0xff]  ;;  %v4159_v30 = vcombine.low %v84_v19, %v92_v20  ;;  %v4161_v31 = vcombine.low %v85_v21, %v93_v22  ;;  %v212_v20 = vld [vmem:[#allocation2 + $0x4b0] sm:$0xff] }
  0xd1   :  { %v4178_v33 = vcombine.high %v101_v28, %v109_v29  ;;  %v220_v21 = vld [vmem:[#allocation2 + $0x4f0] sm:$0xff]  ;;  %v213_v22 = vld [vmem:[#allocation2 + $0x4b8] sm:$0xff] }
  0xd3   :  { %1790 = vmatpush1.bf16.msra.mxu0 %v4299_v36  ;;  %1831 = vmatpush1.bf16.msra.mxu1 %v4301_v37  ;;  %v117_v36 = vld [vmem:[#allocation2 + $0x1b8] sm:$0xff] }
  0xd4   :  { %1791 = vmatprep.subr.bf16.mxu0 %v4316_v38  ;;  %1832 = vmatprep.subr.bf16.mxu1 %v4318_v39  ;;  %v125_v37 = vld [vmem:[#allocation2 + $0x1f8] sm:$0xff]  ;;  %v4175_v38 = vcombine.low %v100_v26, %v108_v27  ;;  %v4177_v39 = vcombine.low %v101_v28, %v109_v29  ;;  %v228_v27 = vld [vmem:[#allocation2 + $0x530] sm:$0xff] }
  0xd5   :  { %v4194_v41 = vcombine.high %v117_v36, %v125_v37  ;;  %v236_v28 = vld [vmem:[#allocation2 + $0x570] sm:$0xff]  ;;  %v229_v29 = vld [vmem:[#allocation2 + $0x538] sm:$0xff] }
  0xd7   :  { %1792 = vmatpush1.bf16.msra.mxu0 %v4315_v44  ;;  %1833 = vmatpush1.bf16.msra.mxu1 %v4317_v45  ;;  %v133_v44 = vld [vmem:[#allocation2 + $0x238] sm:$0xff] }
  0xd8   :  { %1793 = vmatprep.subr.bf16.mxu0 %v4332_v46  ;;  %1834 = vmatprep.subr.bf16.mxu1 %v4334_v47  ;;  %v141_v45 = vld [vmem:[#allocation2 + $0x278] sm:$0xff]  ;;  %v4191_v46 = vcombine.low %v116_v34, %v124_v35  ;;  %v4193_v47 = vcombine.low %v117_v36, %v125_v37  ;;  %v244_v35 = vld [vmem:[#allocation2 + $0x5b0] sm:$0xff] }
  0xd9   :  { %v252_v36 = vld [vmem:[#allocation2 + $0x5f0] sm:$0xff]  ;;  %v245_v37 = vld [vmem:[#allocation2 + $0x5b8] sm:$0xff] }
  0xdb   :  { %1794 = vmatpush1.bf16.msra.mxu0 %v4331_v52  ;;  %1835 = vmatpush1.bf16.msra.mxu1 %v4333_v54  ;;  %v157_v52 = vld [vmem:[#allocation2 + $0x2f8] sm:$0xff]  ;;  %v4207_v54 = vcombine.low %v132_v42, %v140_v43  ;;  %v260_v43 = vld [vmem:[#allocation2 + $0x630] sm:$0xff] }
  0xdc   :  { %1795 = vmatprep.subr.bf16.mxu0 %v4348_v55  ;;  %1836 = vmatprep.subr.bf16.mxu1 %v4350_v56  ;;  %v4209_v55 = vcombine.low %v133_v44, %v141_v45  ;;  %v4224_v56 = vcombine.high %v148_v49, %v156_v50  ;;  %v4226_v58 = vcombine.high %v149_v51, %v157_v52 }
  0xdf   :  { %1796 = vmatpush1.bf16.msra.mxu0 %v4347_v62  ;;  %1837 = vmatpush1.bf16.msra.mxu1 %v4349_v63  ;;  %v173_v62 = vld [vmem:[#allocation2 + $0x378] sm:$0xff]  ;;  %v4223_v63 = vcombine.low %v148_v49, %v156_v50  ;;  %v276_v50 = vld [vmem:[#allocation2 + $0x6b0] sm:$0xff] }
  0xe0   :  { %1797 = vmatprep.subr.bf16.mxu0 %v4364_v0  ;;  %1838 = vmatprep.subr.bf16.mxu1 %v4366_v1  ;;  %v4225_v0 = vcombine.low %v149_v51, %v157_v52  ;;  %v4240_v1 = vcombine.high %v164_v59, %v172_v60  ;;  %v4242_v2 = vcombine.high %v165_v61, %v173_v62  ;;  %v284_v51 = vld [vmem:[#allocation2 + $0x6f0] sm:$0xff]  ;;  %v277_v52 = vld [vmem:[#allocation2 + $0x6b8] sm:$0xff] }
  0xe3   :  { %1798 = vmatpush1.bf16.msra.mxu0 %v4363_v6  ;;  %1839 = vmatpush1.bf16.msra.mxu1 %v4365_v7  ;;  %v189_v6 = vld [vmem:[#allocation2 + $0x3f8] sm:$0xff]  ;;  %v4239_v7 = vcombine.low %v164_v59, %v172_v60  ;;  %v292_v60 = vld [vmem:[#allocation2 + $0x730] sm:$0xff] }
  0xe4   :  { %1799 = vmatprep.subr.bf16.mxu0 %v4380_v8  ;;  %1840 = vmatprep.subr.bf16.mxu1 %v4382_v9  ;;  %v4241_v8 = vcombine.low %v165_v61, %v173_v62  ;;  %v4256_v9 = vcombine.high %v180_v3, %v188_v4  ;;  %v4258_v10 = vcombine.high %v181_v5, %v189_v6  ;;  %v300_v61 = vld [vmem:[#allocation2 + $0x770] sm:$0xff]  ;;  %v293_v62 = vld [vmem:[#allocation2 + $0x738] sm:$0xff] }
  0xe7   :  { %1800 = vmatpush1.bf16.msra.mxu0 %v4379_v15  ;;  %1841 = vmatpush1.bf16.msra.mxu1 %v4381_v16  ;;  %v205_v15 = vld [vmem:[#allocation2 + $0x478] sm:$0xff]  ;;  %v4255_v16 = vcombine.low %v180_v3, %v188_v4  ;;  %v308_v4 = vld [vmem:[#allocation2 + $0x7b0] sm:$0xff] }
  0xe8   :  { %1851 = vmatprep.subr.bf16.mxu0 %v4144_v17  ;;  %1892 = vmatprep.subr.bf16.mxu1 %v4146_v18  ;;  %v4257_v17 = vcombine.low %v181_v5, %v189_v6  ;;  %v4272_v18 = vcombine.high %v196_v11, %v204_v13  ;;  %v4274_v19 = vcombine.high %v197_v14, %v205_v15  ;;  %v316_v5 = vld [vmem:[#allocation2 + $0x7f0] sm:$0xff]  ;;  %v309_v6 = vld [vmem:[#allocation2 + $0x7b8] sm:$0xff] }
  0xea   :  { %1802 = vmatmul.mubr.bf16.vlgmr.msra.gmra.mrb[8].mxu0 %v4888_v12  ;;  %1843 = vmatmul.mubr.bf16.vlgmr.msra.gmra.mrb[8].mxu1 %v4888_v12 }
  0xeb   :  { %1852 = vmatpush1.bf16.msra.mxu0 %v4143_v53  ;;  %1893 = vmatpush1.bf16.msra.mxu1 %v4145_v23  ;;  %v221_v53 = vld [vmem:[#allocation2 + $0x4f8] sm:$0xff]  ;;  %v4271_v23 = vcombine.low %v196_v11, %v204_v13  ;;  %v4383_v13 = vcombine.low %v308_v4, %v316_v5 }
  0xec   :  { %1853 = vmatprep.subr.bf16.mxu0 %v4160_v24  ;;  %1894 = vmatprep.subr.bf16.mxu1 %v4162_v25  ;;  %v4273_v24 = vcombine.low %v197_v14, %v205_v15  ;;  %v4288_v25 = vcombine.high %v212_v20, %v220_v21  ;;  %v4290_v26 = vcombine.high %v213_v22, %v221_v53 }
  0xed   :  { %1883 = vmatprep.mubr.bf16.mxu0 %v4882_v57  ;;  %1924 = vmatprep.mubr.bf16.mxu1 %v4882_v57  ;;  %v4210_v57 = vcombine.high %v133_v44, %v141_v45  ;;  %v268_v44 = vld [vmem:[#allocation2 + $0x670] sm:$0xff]  ;;  %v261_v45 = vld [vmem:[#allocation2 + $0x638] sm:$0xff] }
  0xef   :  { %1854 = vmatpush1.bf16.msra.mxu0 %v4159_v30  ;;  %1895 = vmatpush1.bf16.msra.mxu1 %v4161_v31  ;;  %v237_v30 = vld [vmem:[#allocation2 + $0x578] sm:$0xff]  ;;  %v4287_v31 = vcombine.low %v212_v20, %v220_v21 }
  0xf0   :  { %1855 = vmatprep.subr.bf16.mxu0 %v4176_v32  ;;  %1896 = vmatprep.subr.bf16.mxu1 %v4178_v33  ;;  %v4289_v32 = vcombine.low %v213_v22, %v221_v53  ;;  %v4304_v33 = vcombine.high %v228_v27, %v236_v28  ;;  %v4306_v34 = vcombine.high %v229_v29, %v237_v30  ;;  %v1979_v22 = vld [vmem:[#allocation4] sm:$0xff] }
  0xf1   :  { %v1983_v53 = vld [vmem:[#allocation4 + $0x20] sm:$0xff] }
  0xf3   :  { %1856 = vmatpush1.bf16.msra.mxu0 %v4175_v38  ;;  %1897 = vmatpush1.bf16.msra.mxu1 %v4177_v39  ;;  %v253_v38 = vld [vmem:[#allocation2 + $0x5f8] sm:$0xff]  ;;  %v4303_v39 = vcombine.low %v228_v27, %v236_v28  ;;  %v1984_v27 = vld [vmem:[#allocation4 + $0x28] sm:$0xff]  ;;  %v1987_v28 = vld [vmem:[#allocation4 + $0x40] sm:$0xff] }
  0xf4   :  { %1857 = vmatprep.subr.bf16.mxu0 %v4192_v40  ;;  %1898 = vmatprep.subr.bf16.mxu1 %v4194_v41  ;;  %v4305_v40 = vcombine.low %v229_v29, %v237_v30  ;;  %v4320_v41 = vcombine.high %v244_v35, %v252_v36  ;;  %v4322_v42 = vcombine.high %v245_v37, %v253_v38 }
  0xf7   :  { %1858 = vmatpush1.bf16.msra.mxu0 %v4191_v46  ;;  %1899 = vmatpush1.bf16.msra.mxu1 %v4193_v47  ;;  %v269_v46 = vld [vmem:[#allocation2 + $0x678] sm:$0xff]  ;;  %v4319_v47 = vcombine.low %v244_v35, %v252_v36  ;;  %v1999_v36 = vld [vmem:[#allocation4 + $0xa0] sm:$0xff] }
  0xf8   :  { %1859 = vmatprep.subr.bf16.mxu0 %v4208_v48  ;;  %1900 = vmatprep.subr.bf16.mxu1 %v4210_v57  ;;  %v4321_v48 = vcombine.low %v245_v37, %v253_v38  ;;  %v4336_v57 = vcombine.high %v260_v43, %v268_v44  ;;  %v4338_v49 = vcombine.high %v261_v45, %v269_v46  ;;  %v1996_v37 = vld [vmem:[#allocation4 + $0x88] sm:$0xff] }
  0xf9   :  { %v2000_v38 = vld [vmem:[#allocation4 + $0xa8] sm:$0xff] }
  0xfb   :  { %1860 = vmatpush1.bf16.msra.mxu0 %v4207_v54  ;;  %1901 = vmatpush1.bf16.msra.mxu1 %v4209_v55  ;;  %v285_v54 = vld [vmem:[#allocation2 + $0x6f8] sm:$0xff]  ;;  %v4335_v55 = vcombine.low %v260_v43, %v268_v44  ;;  %v2003_v43 = vld [vmem:[#allocation4 + $0xc0] sm:$0xff] }
  0xfc   :  { %1861 = vmatprep.subr.bf16.mxu0 %v4224_v56  ;;  %1902 = vmatprep.subr.bf16.mxu1 %v4226_v58  ;;  %v4337_v56 = vcombine.low %v261_v45, %v269_v46  ;;  %v4352_v58 = vcombine.high %v276_v50, %v284_v51  ;;  %v4354_v59 = vcombine.high %v277_v52, %v285_v54  ;;  %v2007_v44 = vld [vmem:[#allocation4 + $0xe0] sm:$0xff]  ;;  %v2004_v45 = vld [vmem:[#allocation4 + $0xc8] sm:$0xff] }
  0xfd   :  { %v2008_v46 = vld [vmem:[#allocation4 + $0xe8] sm:$0xff] }
  0xff   :  { %1862 = vmatpush1.bf16.msra.mxu0 %v4223_v63  ;;  %1903 = vmatpush1.bf16.msra.mxu1 %v4225_v0  ;;  %v301_v63 = vld [vmem:[#allocation2 + $0x778] sm:$0xff]  ;;  %v4351_v0 = vcombine.low %v276_v50, %v284_v51  ;;  %v2011_v50 = vld [vmem:[#allocation4 + $0x100] sm:$0xff] }
 0x100   :  { %1863 = vmatprep.subr.bf16.mxu0 %v4240_v1  ;;  %1904 = vmatprep.subr.bf16.mxu1 %v4242_v2  ;;  %v4353_v1 = vcombine.low %v277_v52, %v285_v54  ;;  %v4368_v2 = vcombine.high %v292_v60, %v300_v61  ;;  %v4370_v3 = vcombine.high %v293_v62, %v301_v63  ;;  %v2015_v51 = vld [vmem:[#allocation4 + $0x120] sm:$0xff]  ;;  %v2012_v52 = vld [vmem:[#allocation4 + $0x108] sm:$0xff] }
 0x101   :  { %v2016_v54 = vld [vmem:[#allocation4 + $0x128] sm:$0xff] }
 0x103   :  { %1864 = vmatpush1.bf16.msra.mxu0 %v4239_v7  ;;  %1905 = vmatpush1.bf16.msra.mxu1 %v4241_v8  ;;  %v317_v7 = vld [vmem:[#allocation2 + $0x7f8] sm:$0xff]  ;;  %v4367_v8 = vcombine.low %v292_v60, %v300_v61  ;;  %v2019_v60 = vld [vmem:[#allocation4 + $0x140] sm:$0xff] }
 0x104   :  { %1865 = vmatprep.subr.bf16.mxu0 %v4256_v9  ;;  %1906 = vmatprep.subr.bf16.mxu1 %v4258_v10  ;;  %v4369_v9 = vcombine.low %v293_v62, %v301_v63  ;;  %v4384_v10 = vcombine.high %v308_v4, %v316_v5  ;;  %v4386_v11 = vcombine.high %v309_v6, %v317_v7  ;;  %v2023_v61 = vld [vmem:[#allocation4 + $0x160] sm:$0xff]  ;;  %v2020_v62 = vld [vmem:[#allocation4 + $0x148] sm:$0xff] }
 0x105   :  { %v4385_v14 = vcombine.low %v309_v6, %v317_v7  ;;  %v2024_v63 = vld [vmem:[#allocation4 + $0x168] sm:$0xff]  ;;  %v2027_v4 = vld [vmem:[#allocation4 + $0x180] sm:$0xff] }
 0x106   :  { %v2031_v5 = vld [vmem:[#allocation4 + $0x1a0] sm:$0xff]  ;;  %v2028_v6 = vld [vmem:[#allocation4 + $0x188] sm:$0xff] }
 0x107   :  { %1866 = vmatpush1.bf16.msra.mxu0 %v4255_v16  ;;  %1907 = vmatpush1.bf16.msra.mxu1 %v4257_v17  ;;  %v2032_v7 = vld [vmem:[#allocation4 + $0x1a8] sm:$0xff] }
 0x108   :  { %1867 = vmatprep.subr.bf16.mxu0 %v4272_v18  ;;  %1908 = vmatprep.subr.bf16.mxu1 %v4274_v19 }
 0x10b   :  { %1868 = vmatpush1.bf16.msra.mxu0 %v4271_v23  ;;  %1909 = vmatpush1.bf16.msra.mxu1 %v4273_v24  ;;  %v1980_v23 = vld [vmem:[#allocation4 + $0x8] sm:$0xff] }
 0x10c   :  { %1869 = vmatprep.subr.bf16.mxu0 %v4288_v25  ;;  %1910 = vmatprep.subr.bf16.mxu1 %v4290_v26  ;;  %v4387_v25 = vcombine.low %v1979_v22, %v1983_v53  ;;  %v4388_v26 = vcombine.high %v1979_v22, %v1983_v53  ;;  %v4389_v29 = vcombine.low %v1980_v23, %v1984_v27 }
 0x10d   :  { %v4390_v30 = vcombine.high %v1980_v23, %v1984_v27  ;;  %v4437_v22 = vcombine.low %v2028_v6, %v2032_v7  ;;  %v2048_v27 = vld [vmem:[#allocation4 + $0x228] sm:$0xff] }
 0x10f   :  { %1870 = vmatpush1.bf16.msra.mxu0 %v4287_v31  ;;  %1911 = vmatpush1.bf16.msra.mxu1 %v4289_v32  ;;  %v1988_v32 = vld [vmem:[#allocation4 + $0x48] sm:$0xff] }
 0x110   :  { %1871 = vmatprep.subr.bf16.mxu0 %v4304_v33  ;;  %1912 = vmatprep.subr.bf16.mxu1 %v4306_v34  ;;  %v1992_v33 = vld [vmem:[#allocation4 + $0x68] sm:$0xff]  ;;  %v1995_v34 = vld [vmem:[#allocation4 + $0x80] sm:$0xff] }
 0x111   :  { %v4398_v35 = vcombine.high %v1988_v32, %v1992_v33 }
 0x113   :  { %1872 = vmatpush1.bf16.msra.mxu0 %v4303_v39  ;;  %1913 = vmatpush1.bf16.msra.mxu1 %v4305_v40  ;;  %v4397_v40 = vcombine.low %v1988_v32, %v1992_v33  ;;  %v2055_v32 = vld [vmem:[#allocation4 + $0x260] sm:$0xff]  ;;  %v2052_v33 = vld [vmem:[#allocation4 + $0x248] sm:$0xff] }
 0x114   :  { %1873 = vmatprep.subr.bf16.mxu0 %v4320_v41  ;;  %1914 = vmatprep.subr.bf16.mxu1 %v4322_v42  ;;  %v4404_v41 = vcombine.high %v1995_v34, %v1999_v36  ;;  %v4406_v42 = vcombine.high %v1996_v37, %v2000_v38 }
 0x117   :  { %1874 = vmatpush1.bf16.msra.mxu0 %v4319_v47  ;;  %1915 = vmatpush1.bf16.msra.mxu1 %v4321_v48  ;;  %v4403_v47 = vcombine.low %v1995_v34, %v1999_v36  ;;  %v4405_v48 = vcombine.low %v1996_v37, %v2000_v38  ;;  %v2056_v34 = vld [vmem:[#allocation4 + $0x268] sm:$0xff] }
 0x118   :  { %1875 = vmatprep.subr.bf16.mxu0 %v4336_v57  ;;  %1916 = vmatprep.subr.bf16.mxu1 %v4338_v49  ;;  %v4412_v57 = vcombine.high %v2003_v43, %v2007_v44  ;;  %v4414_v49 = vcombine.high %v2004_v45, %v2008_v46  ;;  %v4462_v38 = vcombine.high %v2052_v33, %v2056_v34 }
 0x11b   :  { %1876 = vmatpush1.bf16.msra.mxu0 %v4335_v55  ;;  %1917 = vmatpush1.bf16.msra.mxu1 %v4337_v56  ;;  %v4411_v55 = vcombine.low %v2003_v43, %v2007_v44  ;;  %v4413_v56 = vcombine.low %v2004_v45, %v2008_v46  ;;  %v4461_v44 = vcombine.low %v2052_v33, %v2056_v34  ;;  %v2092_v34 = vld [vmem:[#allocation4 + $0x388] sm:$0xff] }
 0x11c   :  { %1877 = vmatprep.subr.bf16.mxu0 %v4352_v58  ;;  %1918 = vmatprep.subr.bf16.mxu1 %v4354_v59  ;;  %v4420_v58 = vcombine.high %v2011_v50, %v2015_v51  ;;  %v4422_v59 = vcombine.high %v2012_v52, %v2016_v54 }
 0x11f   :  { %1878 = vmatpush1.bf16.msra.mxu0 %v4351_v0  ;;  %1919 = vmatpush1.bf16.msra.mxu1 %v4353_v1  ;;  %v4419_v0 = vcombine.low %v2011_v50, %v2015_v51  ;;  %v4421_v1 = vcombine.low %v2012_v52, %v2016_v54 }
 0x120   :  { %1879 = vmatprep.subr.bf16.mxu0 %v4368_v2  ;;  %1920 = vmatprep.subr.bf16.mxu1 %v4370_v3  ;;  %v4428_v2 = vcombine.high %v2019_v60, %v2023_v61  ;;  %v4430_v3 = vcombine.high %v2020_v62, %v2024_v63 }
 0x123   :  { %1880 = vmatpush1.bf16.msra.mxu0 %v4367_v8  ;;  %1921 = vmatpush1.bf16.msra.mxu1 %v4369_v9  ;;  %v4427_v8 = vcombine.low %v2019_v60, %v2023_v61  ;;  %v4429_v9 = vcombine.low %v2020_v62, %v2024_v63 }
 0x124   :  { %1881 = vmatprep.subr.bf16.mxu0 %v4384_v10  ;;  %1922 = vmatprep.subr.bf16.mxu1 %v4386_v11  ;;  %v4436_v10 = vcombine.high %v2027_v4, %v2031_v5  ;;  %v4438_v11 = vcombine.high %v2028_v6, %v2032_v7  ;;  %v2088_v7 = vld [vmem:[#allocation4 + $0x368] sm:$0xff] }
 0x127   :  { %1882 = vmatpush1.bf16.msra.mxu0 %v4383_v13  ;;  %1923 = vmatpush1.bf16.msra.mxu1 %v4385_v14  ;;  %v2035_v13 = vld [vmem:[#allocation4 + $0x1c0] sm:$0xff] }
 0x128   :  { %3515 = vmatprep.subr.bf16.mxu0 %v4388_v26  ;;  %3597 = vmatprep.subr.bf16.mxu1 %v4390_v30  ;;  %v2039_v14 = vld [vmem:[#allocation4 + $0x1e0] sm:$0xff]  ;;  %v2044_v26 = vld [vmem:[#allocation4 + $0x208] sm:$0xff] }
 0x129   :  { %v4444_v53 = vcombine.high %v2035_v13, %v2039_v14  ;;  %v4454_v30 = vcombine.high %v2044_v26, %v2048_v27  ;;  %v4453_v36 = vcombine.low %v2044_v26, %v2048_v27  ;;  %v2095_v26 = vld [vmem:[#allocation4 + $0x3a0] sm:$0xff] }
 0x12a   :  { %1884 = vmatmul.mubr.bf16.vlgmr.msra.gmra.mrb[12].mxu0 %v4888_v12  ;;  %1925 = vmatmul.mubr.bf16.vlgmr.msra.gmra.mrb[12].mxu1 %v4888_v12  ;;  %v1991_v12 = vld [vmem:[#allocation4 + $0x60] sm:$0xff] }
 0x12b   :  { %v4396_v31 = vcombine.high %v1987_v28, %v1991_v12  ;;  %3516 = vmatpush1.bf16.msra.mxu0 %v4387_v25  ;;  %v4395_v39 = vcombine.low %v1987_v28, %v1991_v12  ;;  %3598 = vmatpush1.bf16.msra.mxu1 %v4389_v29  ;;  %v2047_v25 = vld [vmem:[#allocation4 + $0x220] sm:$0xff]  ;;  %v4443_v28 = vcombine.low %v2035_v13, %v2039_v14 }
 0x12c   :  { %3599 = vmatprep.subr.bf16.mxu1 %v4398_v35 }
 0x12d   :  { %3517 = vmatprep.subr.bf16.mxu0 %v4396_v31  ;;  %v2051_v31 = vld [vmem:[#allocation4 + $0x240] sm:$0xff] }
 0x12e   :  { %v4460_v37 = vcombine.high %v2051_v31, %v2055_v32  ;;  %v4459_v43 = vcombine.low %v2051_v31, %v2055_v32 }
 0x12f   :  { %3518 = vmatpush1.bf16.msra.mxu0 %v4395_v39  ;;  %3600 = vmatpush1.bf16.msra.mxu1 %v4397_v40  ;;  %v2059_v39 = vld [vmem:[#allocation4 + $0x280] sm:$0xff] }
 0x130   :  { %3519 = vmatprep.subr.bf16.mxu0 %v4404_v41  ;;  %3601 = vmatprep.subr.bf16.mxu1 %v4406_v42  ;;  %v2063_v40 = vld [vmem:[#allocation4 + $0x2a0] sm:$0xff]  ;;  %v2060_v41 = vld [vmem:[#allocation4 + $0x288] sm:$0xff] }
 0x131   :  { %v2064_v42 = vld [vmem:[#allocation4 + $0x2a8] sm:$0xff]  ;;  %v4468_v45 = vcombine.high %v2059_v39, %v2063_v40  ;;  %v4467_v50 = vcombine.low %v2059_v39, %v2063_v40  ;;  %v2103_v39 = vld [vmem:[#allocation4 + $0x3e0] sm:$0xff] }
 0x132   :  { %v4470_v46 = vcombine.high %v2060_v41, %v2064_v42  ;;  %v4469_v51 = vcombine.low %v2060_v41, %v2064_v42  ;;  %v2100_v40 = vld [vmem:[#allocation4 + $0x3c8] sm:$0xff] }
 0x133   :  { %3520 = vmatpush1.bf16.msra.mxu0 %v4403_v47  ;;  %3602 = vmatpush1.bf16.msra.mxu1 %v4405_v48  ;;  %v2067_v47 = vld [vmem:[#allocation4 + $0x2c0] sm:$0xff]  ;;  %v2104_v42 = vld [vmem:[#allocation4 + $0x3e8] sm:$0xff] }
 0x134   :  { %3521 = vmatprep.subr.bf16.mxu0 %v4412_v57  ;;  %3603 = vmatprep.subr.bf16.mxu1 %v4414_v49  ;;  %v2071_v48 = vld [vmem:[#allocation4 + $0x2e0] sm:$0xff]  ;;  %v2068_v57 = vld [vmem:[#allocation4 + $0x2c8] sm:$0xff] }
 0x135   :  { %v2072_v49 = vld [vmem:[#allocation4 + $0x2e8] sm:$0xff]  ;;  %v4476_v52 = vcombine.high %v2067_v47, %v2071_v48  ;;  %v4475_v60 = vcombine.low %v2067_v47, %v2071_v48  ;;  %v4938_v47 = vld [vmem:[#allocation4 + $0x420] sm:$0xff] }
 0x136   :  { %v4478_v54 = vcombine.high %v2068_v57, %v2072_v49  ;;  %v4477_v61 = vcombine.low %v2068_v57, %v2072_v49  ;;  %v4940_v48 = vld [vmem:[#allocation4 + $0x408] sm:$0xff] }
 0x137   :  { %3522 = vmatpush1.bf16.msra.mxu0 %v4411_v55  ;;  %3604 = vmatpush1.bf16.msra.mxu1 %v4413_v56  ;;  %v2075_v55 = vld [vmem:[#allocation4 + $0x300] sm:$0xff]  ;;  %v2112_v49 = vld [vmem:[#allocation4 + $0x428] sm:$0xff] }
 0x138   :  { %3523 = vmatprep.subr.bf16.mxu0 %v4420_v58  ;;  %3605 = vmatprep.subr.bf16.mxu1 %v4422_v59  ;;  %v2079_v56 = vld [vmem:[#allocation4 + $0x320] sm:$0xff]  ;;  %v2076_v58 = vld [vmem:[#allocation4 + $0x308] sm:$0xff] }
 0x139   :  { %v2080_v59 = vld [vmem:[#allocation4 + $0x328] sm:$0xff]  ;;  %v4484_v62 = vcombine.high %v2075_v55, %v2079_v56 }
 0x13a   :  { %v4486_v63 = vcombine.high %v2076_v58, %v2080_v59 }
 0x13b   :  { %3524 = vmatpush1.bf16.msra.mxu0 %v4419_v0  ;;  %3606 = vmatpush1.bf16.msra.mxu1 %v4421_v1  ;;  %v4483_v0 = vcombine.low %v2075_v55, %v2079_v56  ;;  %v4485_v1 = vcombine.low %v2076_v58, %v2080_v59 }
 0x13c   :  { %3525 = vmatprep.subr.bf16.mxu0 %v4428_v2  ;;  %3607 = vmatprep.subr.bf16.mxu1 %v4430_v3  ;;  %v1947_v2 = vlaneseq  ;;  %v2083_v3 = vld [vmem:[#allocation4 + $0x340] sm:$0xff] }
 0x13d   :  { %v4904_v15 = vpop.f32.mrb[0].mxu0  ;;  %v4908_v17 = vpop.f32.mrb[0].mxu1 }
 0x13e   :  { %v4906_v16 = vpop.f32.mrb[1].mxu0  ;;  %v4910_v19 = vpop.f32.mrb[1].mxu1 }
 0x13f   :  { %v1643_v18 = vpop.f32.mrb[2].mxu0  ;;  %v1684_v21 = vpop.f32.mrb[2].mxu1  ;;  %3526 = vmatpush1.bf16.msra.mxu0 %v4427_v8  ;;  %3608 = vmatpush1.bf16.msra.mxu1 %v4429_v9  ;;  %v4914_v9 = vshrl.u32 %v1947_v2, 7 }
 0x140   :  { %v1644_v20 = vpop.f32.mrb[3].mxu0  ;;  %v1685_v24 = vpop.f32.mrb[3].mxu1  ;;  %v2036_v18 = vld [vmem:[#allocation4 + $0x1c8] sm:$0xff]  ;;  %v4435_v21 = vcombine.low %v2027_v4, %v2031_v5  ;;  %3527 = vmatprep.subr.bf16.mxu0 %v4436_v10  ;;  %3609 = vmatprep.subr.bf16.mxu1 %v4438_v11  ;;  %v2087_v4 = vld [vmem:[#allocation4 + $0x360] sm:$0xff] }
 0x141   :  { %v2040_v20 = vld [vmem:[#allocation4 + $0x1e8] sm:$0xff]  ;;  %v2043_v24 = vld [vmem:[#allocation4 + $0x200] sm:$0xff]  ;;  %v4492_v6 = vcombine.high %v2083_v3, %v2087_v4  ;;  %v4491_v10 = vcombine.low %v2083_v3, %v2087_v4 }
 0x142   :  { %v4446_v23 = vcombine.high %v2036_v18, %v2040_v20  ;;  %v4445_v12 = vcombine.low %v2036_v18, %v2040_v20  ;;  %v4452_v29 = vcombine.high %v2043_v24, %v2047_v25  ;;  %v4451_v35 = vcombine.low %v2043_v24, %v2047_v25  ;;  %v2084_v5 = vld [vmem:[#allocation4 + $0x348] sm:$0xff]  ;;  %v2091_v25 = vld [vmem:[#allocation4 + $0x380] sm:$0xff] }
 0x143   :  { %3528 = vmatpush1.bf16.msra.mxu0 %v4435_v21  ;;  %3610 = vmatpush1.bf16.msra.mxu1 %v4437_v22  ;;  %v4493_v11 = vcombine.low %v2084_v5, %v2088_v7  ;;  %v4494_v13 = vcombine.high %v2084_v5, %v2088_v7  ;;  %v1957_v24 = vsub.s32 2, %v4914_v9  ;;  %v4499_v33 = vcombine.low %v2091_v25, %v2095_v26 }
 0x144   :  { %3529 = vmatprep.subr.bf16.mxu0 %v4444_v53  ;;  %3611 = vmatprep.subr.bf16.mxu1 %v4446_v23 }
 0x147   :  { %3530 = vmatpush1.bf16.msra.mxu0 %v4443_v28  ;;  %3612 = vmatpush1.bf16.msra.mxu1 %v4445_v12 }
 0x148   :  { %3531 = vmatprep.subr.bf16.mxu0 %v4452_v29  ;;  %3613 = vmatprep.subr.bf16.mxu1 %v4454_v30  ;;  %v1945_v29 = vld [vmem:[%s5070_s2] sm:$0xf]  ;;  %v4500_v30 = vcombine.high %v2091_v25, %v2095_v26 }
 0x149   :  { %v4934_v32 = vrot.slane %v1945_v29, %v1957_v24 }
 0x14b   :  { %3532 = vmatpush1.bf16.msra.mxu0 %v4451_v35  ;;  %3614 = vmatpush1.bf16.msra.mxu1 %v4453_v36  ;;  %v2096_v35 = vld [vmem:[#allocation4 + $0x3a8] sm:$0xff] }
 0x14c   :  { %3533 = vmatprep.subr.bf16.mxu0 %v4460_v37  ;;  %3615 = vmatprep.subr.bf16.mxu1 %v4462_v38  ;;  %v4501_v36 = vcombine.low %v2092_v34, %v2096_v35  ;;  %v4502_v37 = vcombine.high %v2092_v34, %v2096_v35  ;;  %v2099_v38 = vld [vmem:[#allocation4 + $0x3c0] sm:$0xff] }
 0x14d   :  { %v4508_v41 = vcombine.high %v2099_v38, %v2103_v39 }
 0x14f   :  { %3534 = vmatpush1.bf16.msra.mxu0 %v4459_v43  ;;  %3616 = vmatpush1.bf16.msra.mxu1 %v4461_v44  ;;  %v4507_v43 = vcombine.low %v2099_v38, %v2103_v39  ;;  %v4509_v44 = vcombine.low %v2100_v40, %v2104_v42  ;;  %v2120_v38 = vld [vmem:[#allocation4 + $0x468] sm:$0xff] }
 0x150   :  { %3535 = vmatprep.subr.bf16.mxu0 %v4468_v45  ;;  %3617 = vmatprep.subr.bf16.mxu1 %v4470_v46  ;;  %v4510_v45 = vcombine.high %v2100_v40, %v2104_v42  ;;  %v4936_v46 = vld [vmem:[#allocation4 + $0x400] sm:$0xff]  ;;  %v2128_v39 = vld [vmem:[#allocation4 + $0x4a8] sm:$0xff] }
 0x151   :  { %v4516_v57 = vcombine.high %v4936_v46, %v4938_v47 }
 0x153   :  { %3536 = vmatpush1.bf16.msra.mxu0 %v4467_v50  ;;  %3618 = vmatpush1.bf16.msra.mxu1 %v4469_v51  ;;  %v4515_v50 = vcombine.low %v4936_v46, %v4938_v47  ;;  %v4517_v51 = vcombine.low %v4940_v48, %v2112_v49  ;;  %v2135_v46 = vld [vmem:[#allocation4 + $0x4e0] sm:$0xff]  ;;  %v2132_v47 = vld [vmem:[#allocation4 + $0x4c8] sm:$0xff] }
 0x154   :  { %3537 = vmatprep.subr.bf16.mxu0 %v4476_v52  ;;  %3619 = vmatprep.subr.bf16.mxu1 %v4478_v54  ;;  %v4518_v52 = vcombine.high %v4940_v48, %v2112_v49  ;;  %v2136_v48 = vld [vmem:[#allocation4 + $0x4e8] sm:$0xff] }
 0x157   :  { %3538 = vmatpush1.bf16.msra.mxu0 %v4475_v60  ;;  %3620 = vmatpush1.bf16.msra.mxu1 %v4477_v61 }
 0x158   :  { %3539 = vmatprep.subr.bf16.mxu0 %v4484_v62  ;;  %3621 = vmatprep.subr.bf16.mxu1 %v4486_v63  ;;  %v1949_v63 = vsub.s32 0, %v4914_v9 }
 0x15a   :  { %v1950_v4 = vrot.slane %v1945_v29, %v1949_v63 }
 0x15b   :  { %3540 = vmatpush1.bf16.msra.mxu0 %v4483_v0  ;;  %3622 = vmatpush1.bf16.msra.mxu1 %v4485_v1  ;;  %v1953_v0 = vsub.s32 1, %v4914_v9  ;;  %v1961_v1 = vsub.s32 3, %v4914_v9  ;;  %v4740_v9 = vld [vmem:[%s5075_s7 + $0x8] sm:$0xff]  }
 0x15c   :  { %3541 = vmatprep.subr.bf16.mxu0 %v4492_v6  ;;  %3623 = vmatprep.subr.bf16.mxu1 %v4494_v13 }
 0x15d   :  { %v1962_v26 = vrot.slane %v1945_v29, %v1961_v1  ;;  %v2151_v1 = vld [vmem:[#allocation4 + $0x560] sm:$0xff] }
 0x15f   :  { %3542 = vmatpush1.bf16.msra.mxu0 %v4491_v10  ;;  %3624 = vmatpush1.bf16.msra.mxu1 %v4493_v11  ;;  %v1954_v11 = vrot.slane %v1945_v29, %v1953_v0 }
 0x160   :  { %3543 = vmatprep.subr.bf16.mxu0 %v4500_v30  ;;  %3625 = vmatprep.subr.bf16.mxu1 %v4502_v37  ;;  %v2115_v37 = vld [vmem:[#allocation4 + $0x440] sm:$0xff] }
 0x163   :  { %3544 = vmatpush1.bf16.msra.mxu0 %v4499_v33  ;;  %3626 = vmatpush1.bf16.msra.mxu1 %v4501_v36 }
 0x164   :  { %3545 = vmatprep.subr.bf16.mxu0 %v4508_v41  ;;  %3627 = vmatprep.subr.bf16.mxu1 %v4510_v45  ;;  %v2131_v45 = vld [vmem:[#allocation4 + $0x4c0] sm:$0xff] }
 0x167   :  { %3546 = vmatpush1.bf16.msra.mxu0 %v4507_v43  ;;  %3628 = vmatpush1.bf16.msra.mxu1 %v4509_v44 }
 0x168   :  { %3556 = vmatprep.subr.bf16.mxu0 %v4516_v57  ;;  %3638 = vmatprep.subr.bf16.mxu1 %v4518_v52  ;;  %v2139_v52 = vld [vmem:[#allocation4 + $0x500] sm:$0xff] }
 0x17d   :  { %v4912_v8 = vpop.f32.mrb[4].mxu0  ;;  %v4918_v18 = vpop.f32.mrb[4].mxu1 }
 0x17e   :  { %v1933_v14 = vmax.f32 %v4904_v15, %v4912_v8  ;;  %v4920_v20 = vpop.f32.mrb[5].mxu0  ;;  %v1935_v21 = vmax.f32 %v4908_v17, %v4918_v18  ;;  %v4926_v53 = vpop.f32.mrb[5].mxu1  ;;  %v2119_v18 = vld [vmem:[#allocation4 + $0x460] sm:$0xff] }
 0x17f   :  { %v1934_v22 = vmax.f32 %v4906_v16, %v4920_v20  ;;  %v1725_v23 = vpop.f32.mrb[6].mxu0  ;;  %v1936_v27 = vmax.f32 %v4910_v19, %v4926_v53  ;;  %v1766_v12 = vpop.f32.mrb[6].mxu1  ;;  %v4524_v19 = vcombine.high %v2115_v37, %v2119_v18  ;;  %v4523_v41 = vcombine.low %v2115_v37, %v2119_v18  ;;  %v2172_v37 = vld [vmem:[#allocation4 + $0x608] sm:$0xff] }
 0x180   :  { %v1726_v28 = vpop.f32.mrb[7].mxu0  ;;  %v1767_v31 = vpop.f32.mrb[7].mxu1 }
 0x1bd   :  { %v1803_v54 = vpop.f32.mrb[8].mxu0  ;;  %v1844_v56 = vpop.f32.mrb[8].mxu1 }
 0x1be   :  { %v1805_v55 = vpop.f32.mrb[9].mxu0  ;;  %v1846_v59 = vpop.f32.mrb[9].mxu1 }
 0x1bf   :  { %v1807_v58 = vpop.f32.mrb[10].mxu0  ;;  %v1848_v61 = vpop.f32.mrb[10].mxu1 }
 0x1c0   :  { %v1808_v60 = vpop.f32.mrb[11].mxu0  ;;  %v1849_v62 = vpop.f32.mrb[11].mxu1  ;;  %v4539_v58 = vcombine.low %v2131_v45, %v2135_v46 }
 0x1c1   :  { %v2147_v62 = vld [vmem:[#allocation4 + $0x540] sm:$0xff] }
 0x1fd   :  { %v1885_v2 = vpop.f32.mrb[12].mxu0  ;;  %v1926_v5 = vpop.f32.mrb[12].mxu1 }
 0x1fe   :  { %v1937_v3 = vmax.f32 %v1803_v54, %v1885_v2  ;;  %v1887_v6 = vpop.f32.mrb[13].mxu0  ;;  %v1939_v7 = vmax.f32 %v1844_v56, %v1926_v5  ;;  %v1928_v13 = vpop.f32.mrb[13].mxu1  ;;  %v2143_v54 = vld [vmem:[#allocation4 + $0x520] sm:$0xff]  ;;  %v2144_v56 = vld [vmem:[#allocation4 + $0x528] sm:$0xff] }
 0x1ff   :  { %v1938_v10 = vmax.f32 %v1805_v55, %v1887_v6  ;;  %v1889_v23 = vpop.f32.mrb[14].mxu0  ;;  %v1940_v25 = vmax.f32 %v1846_v59, %v1928_v13  ;;  %v1930_v12 = vpop.f32.mrb[14].mxu1  ;;  %v2140_v55 = vld [vmem:[#allocation4 + $0x508] sm:$0xff]  ;;  %v4541_v59 = vcombine.low %v2132_v47, %v2136_v48  ;;  %v4548_v60 = vcombine.high %v2139_v52, %v2143_v54 }
 0x200   :  { %v1941_v24 = vmax.f32 %v1933_v14, %v1937_v3  ;;  %v1890_v28 = vpop.f32.mrb[15].mxu0  ;;  %v1943_v30 = vmax.f32 %v1935_v21, %v1939_v7  ;;  %v1931_v33 = vpop.f32.mrb[15].mxu1  ;;  %v2116_v21 = vld [vmem:[#allocation4 + $0x448] sm:$0xff]  ;;  %v4550_v61 = vcombine.high %v2140_v55, %v2144_v56  ;;  %v4549_v5 = vcombine.low %v2140_v55, %v2144_v56  ;;  %v2163_v12 = vld [vmem:[#allocation4 + $0x5c0] sm:$0xff] }
 0x201   :  { %v1942_v31 = vmax.f32 %v1934_v22, %v1938_v10  ;;  %v1944_v35 = vmax.f32 %v1936_v27, %v1940_v25  ;;  %v2123_v22 = vld [vmem:[#allocation4 + $0x480] sm:$0xff]  ;;  %v4526_v53 = vcombine.high %v2116_v21, %v2120_v38  ;;  %v4525_v42 = vcombine.low %v2116_v21, %v2120_v38  ;;  %v2148_v2 = vld [vmem:[#allocation4 + $0x548] sm:$0xff] }
 0x202   :  { %v1967_v34 = vadd.f32 %v1950_v4, %v1941_v24  ;;  %v4968_v15 = vadd.f32 %v4934_v32, %v1943_v30  ;;  %v2127_v27 = vld [vmem:[#allocation4 + $0x4a0] sm:$0xff]  ;;  %v2124_v32 = vld [vmem:[#allocation4 + $0x488] sm:$0xff]  ;;  %v4547_v4 = vcombine.low %v2139_v52, %v2143_v54  ;;  %v4556_v6 = vcombine.high %v2147_v62, %v2151_v1 }
 0x203   :  { %v1968_v8 = vadd.f32 %v1954_v11, %v1942_v31  ;;  %v1970_v29 = vadd.f32 %v1962_v26, %v1944_v35  ;;  %v4532_v43 = vcombine.high %v2123_v22, %v2127_v27  ;;  %v4534_v44 = vcombine.high %v2124_v32, %v2128_v39  ;;  %v2152_v3 = vld [vmem:[#allocation4 + $0x568] sm:$0xff]  ;;  %v2155_v10 = vld [vmem:[#allocation4 + $0x580] sm:$0xff] }
 0x204   :  { %v1971_v14 = vmax.f32 %v1967_v34, 0.0  ;;  %v4531_v57 = vcombine.low %v2123_v22, %v2127_v27  ;;  %v4533_v49 = vcombine.low %v2124_v32, %v2128_v39  ;;  %v4558_v7 = vcombine.high %v2148_v2, %v2152_v3  ;;  %v2159_v11 = vld [vmem:[#allocation4 + $0x5a0] sm:$0xff]  ;;  %v2156_v13 = vld [vmem:[#allocation4 + $0x588] sm:$0xff] }
 0x205   :  { %v1972_v36 = vmax.f32 %v1968_v8, 0.0  ;;  %v1974_v17 = vmax.f32 %v1970_v29, 0.0  ;;  %v2160_v23 = vld [vmem:[#allocation4 + $0x5a8] sm:$0xff]  ;;  %v4555_v24 = vcombine.low %v2147_v62, %v2151_v1  ;;  %v4557_v25 = vcombine.low %v2148_v2, %v2152_v3  ;;  %v2167_v30 = vld [vmem:[#allocation4 + $0x5e0] sm:$0xff] }
 0x206   :  { %v4972_v20 = vpack.c.bf16 %v1971_v14, %v1971_v14  ;;  %v4564_v26 = vcombine.high %v2155_v10, %v2159_v11  ;;  %v4566_v28 = vcombine.high %v2156_v13, %v2160_v23  ;;  %v2164_v31 = vld [vmem:[#allocation4 + $0x5c8] sm:$0xff]  ;;  %v4563_v34 = vcombine.low %v2155_v10, %v2159_v11  ;;  %v2171_v29 = vld [vmem:[#allocation4 + $0x600] sm:$0xff] }
 0x207   :  { %v4970_v16 = vpack.c.bf16 %v1972_v36, %v1972_v36  ;;  %v4976_v40 = vpack.c.bf16 %v1974_v17, %v1974_v17  ;;  %v2168_v33 = vld [vmem:[#allocation4 + $0x5e8] sm:$0xff]  ;;  %v4565_v35 = vcombine.low %v2156_v13, %v2160_v23  ;;  %v4572_v8 = vcombine.high %v2163_v12, %v2167_v30  ;;  %v2175_v36 = vld [vmem:[#allocation4 + $0x620] sm:$0xff] }
 0x208   :  { %v4574_v14 = vcombine.high %v2164_v31, %v2168_v33  ;;  %v2176_v17 = vld [vmem:[#allocation4 + $0x628] sm:$0xff]  ;;  %v4571_v18 = vcombine.low %v2163_v12, %v2167_v30  ;;  %v4573_v21 = vcombine.low %v2164_v31, %v2168_v33  ;;  %v4580_v38 = vcombine.high %v2171_v29, %v2175_v36  ;;  %v2199_v52 = vld [vmem:[#allocation4 + $0x6e0] sm:$0xff] }
 0x209   :  { %3547 = vmatprep.mubr.bf16.mxu0 %v4970_v16  ;;  %3629 = vmatprep.mubr.bf16.mxu1 %v4970_v16  ;;  %v4582_v22 = vcombine.high %v2172_v37, %v2176_v17  ;;  %v2180_v27 = vld [vmem:[#allocation4 + $0x648] sm:$0xff]  ;;  %v4579_v39 = vcombine.low %v2171_v29, %v2175_v36  ;;  %v2207_v62 = vld [vmem:[#allocation4 + $0x720] sm:$0xff] }
 0x20a   :  { %3548 = vmatmul.mubr.bf16.vlgmr.msra.gmra.mrb[16].mxu0 %v4972_v20  ;;  %3630 = vmatmul.mubr.bf16.vlgmr.msra.gmra.mrb[16].mxu1 %v4972_v20  ;;  %v2184_v32 = vld [vmem:[#allocation4 + $0x668] sm:$0xff]  ;;  %v2215_v10 = vld [vmem:[#allocation4 + $0x760] sm:$0xff] }
 0x20b   :  { %3557 = vmatpush1.bf16.msra.mxu0 %v4515_v50  ;;  %3639 = vmatpush1.bf16.msra.mxu1 %v4517_v51  ;;  %v4540_v50 = vcombine.high %v2131_v45, %v2135_v46  ;;  %v4542_v51 = vcombine.high %v2132_v47, %v2136_v48  ;;  %v2191_v45 = vld [vmem:[#allocation4 + $0x6a0] sm:$0xff]  ;;  %v2188_v46 = vld [vmem:[#allocation4 + $0x688] sm:$0xff] }
 0x20c   :  { %3588 = vmatprep.mubr.bf16.mxu0 %v4976_v40  ;;  %3670 = vmatprep.mubr.bf16.mxu1 %v4976_v40  ;;  %v2192_v47 = vld [vmem:[#allocation4 + $0x6a8] sm:$0xff]  ;;  %v2223_v12 = vld [vmem:[#allocation4 + $0x7a0] sm:$0xff] }
 0x20d   :  { %3558 = vmatprep.subr.bf16.mxu0 %v4524_v19  ;;  %3640 = vmatprep.subr.bf16.mxu1 %v4526_v53  ;;  %v2179_v19 = vld [vmem:[#allocation4 + $0x640] sm:$0xff]  ;;  %v2196_v54 = vld [vmem:[#allocation4 + $0x6c8] sm:$0xff] }
 0x20e   :  { %v2183_v53 = vld [vmem:[#allocation4 + $0x660] sm:$0xff]  ;;  %v2200_v55 = vld [vmem:[#allocation4 + $0x6e8] sm:$0xff] }
 0x20f   :  { %3559 = vmatpush1.bf16.msra.mxu0 %v4523_v41  ;;  %3641 = vmatpush1.bf16.msra.mxu1 %v4525_v42  ;;  %v4581_v41 = vcombine.low %v2172_v37, %v2176_v17  ;;  %v4588_v42 = vcombine.high %v2179_v19, %v2183_v53  ;;  %v4587_v48 = vcombine.low %v2179_v19, %v2183_v53  ;;  %v2204_v1 = vld [vmem:[#allocation4 + $0x708] sm:$0xff]  ;;  %v2231_v29 = vld [vmem:[#allocation4 + $0x7e0] sm:$0xff]  ;;  %v1985_v19 = vld [vmem:[#allocation4 + $0x30] sm:$0xff] }
 0x210   :  { %3560 = vmatprep.subr.bf16.mxu0 %v4532_v43  ;;  %3642 = vmatprep.subr.bf16.mxu1 %v4534_v44  ;;  %v4590_v43 = vcombine.high %v2180_v27, %v2184_v32  ;;  %v2187_v44 = vld [vmem:[#allocation4 + $0x680] sm:$0xff]  ;;  %v2208_v2 = vld [vmem:[#allocation4 + $0x728] sm:$0xff]  ;;  %v1982_v53 = vld [vmem:[#allocation4 + $0x18] sm:$0xff] }
 0x211   :  { %v4595_v56 = vcombine.low %v2187_v44, %v2191_v45  ;;  %v2212_v11 = vld [vmem:[#allocation4 + $0x748] sm:$0xff] }
 0x212   :  { %v2216_v13 = vld [vmem:[#allocation4 + $0x768] sm:$0xff] }
 0x213   :  { %3561 = vmatpush1.bf16.msra.mxu0 %v4531_v57  ;;  %3643 = vmatpush1.bf16.msra.mxu1 %v4533_v49  ;;  %v4589_v57 = vcombine.low %v2180_v27, %v2184_v32  ;;  %v4596_v49 = vcombine.high %v2187_v44, %v2191_v45  ;;  %v2220_v30 = vld [vmem:[#allocation4 + $0x788] sm:$0xff]  ;;  %v1986_v27 = vld [vmem:[#allocation4 + $0x38] sm:$0xff]  ;;  %v1989_v44 = vld [vmem:[#allocation4 + $0x50] sm:$0xff] }
 0x214   :  { %3562 = vmatprep.subr.bf16.mxu0 %v4540_v50  ;;  %3644 = vmatprep.subr.bf16.mxu1 %v4542_v51  ;;  %v4598_v50 = vcombine.high %v2188_v46, %v2192_v47  ;;  %v2195_v51 = vld [vmem:[#allocation4 + $0x6c0] sm:$0xff]  ;;  %v2224_v31 = vld [vmem:[#allocation4 + $0x7a8] sm:$0xff]  ;;  %v1993_v45 = vld [vmem:[#allocation4 + $0x70] sm:$0xff] }
 0x215   :  { %v4603_v3 = vcombine.low %v2195_v51, %v2199_v52  ;;  %v2228_v36 = vld [vmem:[#allocation4 + $0x7c8] sm:$0xff] }
 0x216   :  { %v2232_v37 = vld [vmem:[#allocation4 + $0x7e8] sm:$0xff] }
 0x217   :  { %3563 = vmatpush1.bf16.msra.mxu0 %v4539_v58  ;;  %3645 = vmatpush1.bf16.msra.mxu1 %v4541_v59  ;;  %v4597_v58 = vcombine.low %v2188_v46, %v2192_v47  ;;  %v4604_v59 = vcombine.high %v2195_v51, %v2199_v52  ;;  %v1990_v46 = vld [vmem:[#allocation4 + $0x58] sm:$0xff]  ;;  %v1997_v52 = vld [vmem:[#allocation4 + $0x90] sm:$0xff] }
 0x218   :  { %3564 = vmatprep.subr.bf16.mxu0 %v4548_v60  ;;  %3646 = vmatprep.subr.bf16.mxu1 %v4550_v61  ;;  %v4606_v60 = vcombine.high %v2196_v54, %v2200_v55  ;;  %v2203_v61 = vld [vmem:[#allocation4 + $0x700] sm:$0xff]  ;;  %v1994_v47 = vld [vmem:[#allocation4 + $0x78] sm:$0xff] }
 0x219   :  { %v4611_v23 = vcombine.low %v2203_v61, %v2207_v62  ;;  %v4402_v51 = vcombine.high %v1990_v46, %v1994_v47 }
 0x21b   :  { %3565 = vmatpush1.bf16.msra.mxu0 %v4547_v4  ;;  %3647 = vmatpush1.bf16.msra.mxu1 %v4549_v5  ;;  %v4605_v4 = vcombine.low %v2196_v54, %v2200_v55  ;;  %v4612_v5 = vcombine.high %v2203_v61, %v2207_v62  ;;  %v1998_v54 = vld [vmem:[#allocation4 + $0x98] sm:$0xff]  ;;  %v2005_v61 = vld [vmem:[#allocation4 + $0xd0] sm:$0xff] }
 0x21c   :  { %3566 = vmatprep.subr.bf16.mxu0 %v4556_v6  ;;  %3648 = vmatprep.subr.bf16.mxu1 %v4558_v7  ;;  %v4614_v6 = vcombine.high %v2204_v1, %v2208_v2  ;;  %v2211_v7 = vld [vmem:[#allocation4 + $0x740] sm:$0xff]  ;;  %v2002_v55 = vld [vmem:[#allocation4 + $0xb8] sm:$0xff]  ;;  %v2009_v62 = vld [vmem:[#allocation4 + $0xf0] sm:$0xff] }
 0x21d   :  { %v4619_v33 = vcombine.low %v2211_v7, %v2215_v10 }
 0x21f   :  { %3567 = vmatpush1.bf16.msra.mxu0 %v4555_v24  ;;  %3649 = vmatpush1.bf16.msra.mxu1 %v4557_v25  ;;  %v4613_v24 = vcombine.low %v2204_v1, %v2208_v2  ;;  %v4620_v25 = vcombine.high %v2211_v7, %v2215_v10  ;;  %v2006_v1 = vld [vmem:[#allocation4 + $0xd8] sm:$0xff]  ;;  %v2013_v7 = vld [vmem:[#allocation4 + $0x110] sm:$0xff] }
 0x220   :  { %3568 = vmatprep.subr.bf16.mxu0 %v4564_v26  ;;  %3650 = vmatprep.subr.bf16.mxu1 %v4566_v28  ;;  %v4622_v26 = vcombine.high %v2212_v11, %v2216_v13  ;;  %v2219_v28 = vld [vmem:[#allocation4 + $0x780] sm:$0xff]  ;;  %v2010_v2 = vld [vmem:[#allocation4 + $0xf8] sm:$0xff]  ;;  %v2017_v10 = vld [vmem:[#allocation4 + $0x130] sm:$0xff] }
 0x221   :  { %v4627_v17 = vcombine.low %v2219_v28, %v2223_v12 }
 0x223   :  { %3569 = vmatpush1.bf16.msra.mxu0 %v4563_v34  ;;  %3651 = vmatpush1.bf16.msra.mxu1 %v4565_v35  ;;  %v4621_v34 = vcombine.low %v2212_v11, %v2216_v13  ;;  %v4628_v35 = vcombine.high %v2219_v28, %v2223_v12  ;;  %v2018_v11 = vld [vmem:[#allocation4 + $0x138] sm:$0xff]  ;;  %v4415_v13 = vcombine.low %v2005_v61, %v2009_v62  ;;  %v2025_v28 = vld [vmem:[#allocation4 + $0x170] sm:$0xff] }
 0x224   :  { %3570 = vmatprep.subr.bf16.mxu0 %v4572_v8  ;;  %3652 = vmatprep.subr.bf16.mxu1 %v4574_v14  ;;  %v4630_v8 = vcombine.high %v2220_v30, %v2224_v31  ;;  %v2227_v14 = vld [vmem:[#allocation4 + $0x7c0] sm:$0xff]  ;;  %v2022_v12 = vld [vmem:[#allocation4 + $0x158] sm:$0xff] }
 0x225   :  { %v4635_v32 = vcombine.low %v2227_v14, %v2231_v29 }
 0x227   :  { %3571 = vmatpush1.bf16.msra.mxu0 %v4571_v18  ;;  %3653 = vmatpush1.bf16.msra.mxu1 %v4573_v21  ;;  %v4629_v18 = vcombine.low %v2220_v30, %v2224_v31  ;;  %v4636_v21 = vcombine.high %v2227_v14, %v2231_v29  ;;  %v2026_v30 = vld [vmem:[#allocation4 + $0x178] sm:$0xff]  ;;  %v4423_v31 = vcombine.low %v2013_v7, %v2017_v10  ;;  %v2033_v14 = vld [vmem:[#allocation4 + $0x1b0] sm:$0xff] }
 0x228   :  { %3572 = vmatprep.subr.bf16.mxu0 %v4580_v38  ;;  %3654 = vmatprep.subr.bf16.mxu1 %v4582_v22  ;;  %v4638_v38 = vcombine.high %v2228_v36, %v2232_v37  ;;  %v1981_v22 = vld [vmem:[#allocation4 + $0x10] sm:$0xff]  ;;  %v2030_v29 = vld [vmem:[#allocation4 + $0x198] sm:$0xff] }
 0x22b   :  { %3573 = vmatpush1.bf16.msra.mxu0 %v4579_v39  ;;  %3655 = vmatpush1.bf16.msra.mxu1 %v4581_v41  ;;  %v4637_v39 = vcombine.low %v2228_v36, %v2232_v37  ;;  %v1973_v41 = vmax.f32 %v4968_v15, 0.0  ;;  %v2001_v15 = vld [vmem:[#allocation4 + $0xb0] sm:$0xff]  ;;  %v2034_v36 = vld [vmem:[#allocation4 + $0x1b8] sm:$0xff] }
 0x22c   :  { %3574 = vmatprep.subr.bf16.mxu0 %v4588_v42  ;;  %3656 = vmatprep.subr.bf16.mxu1 %v4590_v43  ;;  %v4392_v42 = vcombine.high %v1981_v22, %v1985_v19  ;;  %v4394_v43 = vcombine.high %v1982_v53, %v1986_v27 }
 0x22f   :  { %3575 = vmatpush1.bf16.msra.mxu0 %v4587_v48  ;;  %3657 = vmatpush1.bf16.msra.mxu1 %v4589_v57  ;;  %v4391_v48 = vcombine.low %v1981_v22, %v1985_v19  ;;  %v4983_v57 = vpack.c.bf16 %v1973_v41, %v1973_v41  ;;  %v2041_v22 = vld [vmem:[#allocation4 + $0x1f0] sm:$0xff]  ;;  %v2038_v19 = vld [vmem:[#allocation4 + $0x1d8] sm:$0xff] }
 0x230   :  { %3576 = vmatprep.subr.bf16.mxu0 %v4596_v49  ;;  %3658 = vmatprep.subr.bf16.mxu1 %v4598_v50  ;;  %v4393_v49 = vcombine.low %v1982_v53, %v1986_v27  ;;  %v4400_v50 = vcombine.high %v1989_v44, %v1993_v45  ;;  %v2042_v53 = vld [vmem:[#allocation4 + $0x1f8] sm:$0xff] }
 0x231   :  { %v4450_v41 = vcombine.high %v2038_v19, %v2042_v53 }
 0x233   :  { %3577 = vmatpush1.bf16.msra.mxu0 %v4595_v56  ;;  %3659 = vmatpush1.bf16.msra.mxu1 %v4597_v58  ;;  %v4399_v56 = vcombine.low %v1989_v44, %v1993_v45  ;;  %v4401_v58 = vcombine.low %v1990_v46, %v1994_v47  ;;  %v2046_v44 = vld [vmem:[#allocation4 + $0x218] sm:$0xff]  ;;  %v4449_v47 = vcombine.low %v2038_v19, %v2042_v53 }
 0x234   :  { %3578 = vmatprep.subr.bf16.mxu0 %v4604_v59  ;;  %3660 = vmatprep.subr.bf16.mxu1 %v4606_v60  ;;  %v4408_v59 = vcombine.high %v1997_v52, %v2001_v15  ;;  %v4410_v60 = vcombine.high %v1998_v54, %v2002_v55  ;;  %v2050_v45 = vld [vmem:[#allocation4 + $0x238] sm:$0xff] }
 0x237   :  { %3579 = vmatpush1.bf16.msra.mxu0 %v4603_v3  ;;  %3661 = vmatpush1.bf16.msra.mxu1 %v4605_v4  ;;  %v4407_v3 = vcombine.low %v1997_v52, %v2001_v15  ;;  %v4409_v4 = vcombine.low %v1998_v54, %v2002_v55  ;;  %v2054_v52 = vld [vmem:[#allocation4 + $0x258] sm:$0xff]  ;;  %v4457_v55 = vcombine.low %v2046_v44, %v2050_v45 }
 0x238   :  { %3580 = vmatprep.subr.bf16.mxu0 %v4612_v5  ;;  %3662 = vmatprep.subr.bf16.mxu1 %v4614_v6  ;;  %v4416_v5 = vcombine.high %v2005_v61, %v2009_v62  ;;  %v4418_v6 = vcombine.high %v2006_v1, %v2010_v2  ;;  %v2058_v15 = vld [vmem:[#allocation4 + $0x278] sm:$0xff] }
 0x239   :  { %v2062_v61 = vld [vmem:[#allocation4 + $0x298] sm:$0xff] }
 0x23a   :  { %v2066_v62 = vld [vmem:[#allocation4 + $0x2b8] sm:$0xff] }
 0x23b   :  { %3581 = vmatpush1.bf16.msra.mxu0 %v4611_v23  ;;  %3663 = vmatpush1.bf16.msra.mxu1 %v4613_v24  ;;  %v4417_v23 = vcombine.low %v2006_v1, %v2010_v2  ;;  %v4424_v24 = vcombine.high %v2013_v7, %v2017_v10  ;;  %v4465_v2 = vcombine.low %v2054_v52, %v2058_v15  ;;  %v2070_v7 = vld [vmem:[#allocation4 + $0x2d8] sm:$0xff] }
 0x23c   :  { %3582 = vmatprep.subr.bf16.mxu0 %v4620_v25  ;;  %3664 = vmatprep.subr.bf16.mxu1 %v4622_v26  ;;  %v2021_v26 = vld [vmem:[#allocation4 + $0x150] sm:$0xff]  ;;  %v2074_v10 = vld [vmem:[#allocation4 + $0x2f8] sm:$0xff] }
 0x23d   :  { %v4431_v37 = vcombine.low %v2021_v26, %v2025_v28 }
 0x23f   :  { %3583 = vmatpush1.bf16.msra.mxu0 %v4619_v33  ;;  %3665 = vmatpush1.bf16.msra.mxu1 %v4621_v34  ;;  %v4432_v34 = vcombine.high %v2021_v26, %v2025_v28  ;;  %v2078_v26 = vld [vmem:[#allocation4 + $0x318] sm:$0xff] }
 0x240   :  { %3584 = vmatprep.subr.bf16.mxu0 %v4628_v35  ;;  %3666 = vmatprep.subr.bf16.mxu1 %v4630_v8  ;;  %v4434_v35 = vcombine.high %v2022_v12, %v2026_v30  ;;  %v2029_v8 = vld [vmem:[#allocation4 + $0x190] sm:$0xff]  ;;  %v2082_v28 = vld [vmem:[#allocation4 + $0x338] sm:$0xff] }
 0x241   :  { %v4439_v27 = vcombine.low %v2029_v8, %v2033_v14 }
 0x243   :  { %3585 = vmatpush1.bf16.msra.mxu0 %v4627_v17  ;;  %3667 = vmatpush1.bf16.msra.mxu1 %v4629_v18  ;;  %v4433_v17 = vcombine.low %v2022_v12, %v2026_v30  ;;  %v4440_v18 = vcombine.high %v2029_v8, %v2033_v14  ;;  %v4481_v30 = vcombine.low %v2070_v7, %v2074_v10  ;;  %v2086_v8 = vld [vmem:[#allocation4 + $0x358] sm:$0xff] }
 0x244   :  { %3586 = vmatprep.subr.bf16.mxu0 %v4636_v21  ;;  %3668 = vmatprep.subr.bf16.mxu1 %v4638_v38  ;;  %v4442_v21 = vcombine.high %v2030_v29, %v2034_v36  ;;  %v2037_v38 = vld [vmem:[#allocation4 + $0x1d0] sm:$0xff]  ;;  %v2090_v14 = vld [vmem:[#allocation4 + $0x378] sm:$0xff] }
 0x245   :  { %v4447_v46 = vcombine.low %v2037_v38, %v2041_v22  ;;  %v4497_v53 = vcombine.low %v2086_v8, %v2090_v14 }
 0x247   :  { %3587 = vmatpush1.bf16.msra.mxu0 %v4635_v32  ;;  %3669 = vmatpush1.bf16.msra.mxu1 %v4637_v39  ;;  %v4441_v32 = vcombine.low %v2030_v29, %v2034_v36  ;;  %v4448_v39 = vcombine.high %v2037_v38, %v2041_v22  ;;  %v4489_v36 = vcombine.low %v2078_v26, %v2082_v28  ;;  %v2094_v38 = vld [vmem:[#allocation4 + $0x398] sm:$0xff] }
 0x248   :  { %3679 = vmatprep.subr.bf16.mxu0 %v4392_v42  ;;  %3761 = vmatprep.subr.bf16.mxu1 %v4394_v43  ;;  %v2045_v42 = vld [vmem:[#allocation4 + $0x210] sm:$0xff]  ;;  %v2098_v22 = vld [vmem:[#allocation4 + $0x3b8] sm:$0xff] }
 0x249   :  { %v2049_v43 = vld [vmem:[#allocation4 + $0x230] sm:$0xff] }
 0x24a   :  { %3589 = vmatmul.mubr.bf16.vlgmr.msra.gmra.mrb[16].mxu0 %v4983_v57  ;;  %3671 = vmatmul.mubr.bf16.vlgmr.msra.gmra.mrb[16].mxu1 %v4983_v57  ;;  %v4455_v54 = vcombine.low %v2045_v42, %v2049_v43 }
 0x24b   :  { %3680 = vmatpush1.bf16.msra.mxu0 %v4391_v48  ;;  %3711 = vmatprep.mubr.bf16.mxu0 %v4970_v16  ;;  %v4456_v48 = vcombine.high %v2045_v42, %v2049_v43  ;;  %v2102_v42 = vld [vmem:[#allocation4 + $0x3d8] sm:$0xff] }
 0x24c   :  { %3762 = vmatpush1.bf16.msra.mxu1 %v4393_v49  ;;  %3793 = vmatprep.mubr.bf16.mxu1 %v4970_v16  ;;  %v2014_v16 = vld [vmem:[#allocation4 + $0x118] sm:$0xff]  ;;  %v4458_v49 = vcombine.high %v2046_v44, %v2050_v45  ;;  %v4505_v45 = vcombine.low %v2094_v38, %v2098_v22 }
 0x24d   :  { %3681 = vmatprep.subr.bf16.mxu0 %v4400_v50  ;;  %3763 = vmatprep.subr.bf16.mxu1 %v4402_v51  ;;  %v4426_v25 = vcombine.high %v2014_v16, %v2018_v11  ;;  %v4425_v33 = vcombine.low %v2014_v16, %v2018_v11  ;;  %v2053_v50 = vld [vmem:[#allocation4 + $0x250] sm:$0xff]  ;;  %v4473_v11 = vcombine.low %v2062_v61, %v2066_v62  ;;  %v2106_v43 = vld [vmem:[#allocation4 + $0x3f8] sm:$0xff] }
 0x24e   :  { %v2057_v51 = vld [vmem:[#allocation4 + $0x270] sm:$0xff] }
 0x24f   :  { %3682 = vmatpush1.bf16.msra.mxu0 %v4399_v56  ;;  %v4464_v56 = vcombine.high %v2053_v50, %v2057_v51  ;;  %v4463_v1 = vcombine.low %v2053_v50, %v2057_v51  ;;  %v2110_v50 = vld [vmem:[#allocation4 + $0x418] sm:$0xff] }
 0x250   :  { %3764 = vmatpush1.bf16.msra.mxu1 %v4401_v58  ;;  %3683 = vmatprep.subr.bf16.mxu0 %v4408_v59  ;;  %v4466_v58 = vcombine.high %v2054_v52, %v2058_v15  ;;  %v2061_v59 = vld [vmem:[#allocation4 + $0x290] sm:$0xff]  ;;  %v2114_v51 = vld [vmem:[#allocation4 + $0x438] sm:$0xff]  ;;  %v4513_v15 = vcombine.low %v2102_v42, %v2106_v43 }
 0x251   :  { %3765 = vmatprep.subr.bf16.mxu1 %v4410_v60  ;;  %v2065_v60 = vld [vmem:[#allocation4 + $0x2b0] sm:$0xff] }
 0x252   :  { %v4471_v16 = vcombine.low %v2061_v59, %v2065_v60 }
 0x253   :  { %3684 = vmatpush1.bf16.msra.mxu0 %v4407_v3  ;;  %v4472_v3 = vcombine.high %v2061_v59, %v2065_v60  ;;  %v2118_v60 = vld [vmem:[#allocation4 + $0x458] sm:$0xff] }
 0x254   :  { %3766 = vmatpush1.bf16.msra.mxu1 %v4409_v4  ;;  %3685 = vmatprep.subr.bf16.mxu0 %v4416_v5  ;;  %v4474_v4 = vcombine.high %v2062_v61, %v2066_v62  ;;  %v2069_v5 = vld [vmem:[#allocation4 + $0x2d0] sm:$0xff]  ;;  %v2122_v61 = vld [vmem:[#allocation4 + $0x478] sm:$0xff]  ;;  %v4521_v62 = vcombine.low %v2110_v50, %v2114_v51 }
 0x255   :  { %3767 = vmatprep.subr.bf16.mxu1 %v4418_v6  ;;  %v2073_v6 = vld [vmem:[#allocation4 + $0x2f0] sm:$0xff] }
 0x256   :  { %v4479_v12 = vcombine.low %v2069_v5, %v2073_v6 }
 0x257   :  { %3686 = vmatpush1.bf16.msra.mxu0 %v4415_v13  ;;  %v4480_v13 = vcombine.high %v2069_v5, %v2073_v6  ;;  %v2126_v5 = vld [vmem:[#allocation4 + $0x498] sm:$0xff] }
 0x258   :  { %3768 = vmatpush1.bf16.msra.mxu1 %v4417_v23  ;;  %3687 = vmatprep.subr.bf16.mxu0 %v4424_v24  ;;  %v4482_v23 = vcombine.high %v2070_v7, %v2074_v10  ;;  %v2077_v24 = vld [vmem:[#allocation4 + $0x310] sm:$0xff]  ;;  %v2130_v6 = vld [vmem:[#allocation4 + $0x4b8] sm:$0xff]  ;;  %v4529_v10 = vcombine.low %v2118_v60, %v2122_v61 }
 0x259   :  { %3769 = vmatprep.subr.bf16.mxu1 %v4426_v25  ;;  %v2081_v25 = vld [vmem:[#allocation4 + $0x330] sm:$0xff] }
 0x25a   :  { %v4487_v29 = vcombine.low %v2077_v24, %v2081_v25 }
 0x25b   :  { %3688 = vmatpush1.bf16.msra.mxu0 %v4423_v31  ;;  %v4488_v31 = vcombine.high %v2077_v24, %v2081_v25  ;;  %v2134_v24 = vld [vmem:[#allocation4 + $0x4d8] sm:$0xff] }
 0x25c   :  { %3770 = vmatpush1.bf16.msra.mxu1 %v4425_v33  ;;  %3689 = vmatprep.subr.bf16.mxu0 %v4432_v34  ;;  %v4490_v33 = vcombine.high %v2078_v26, %v2082_v28  ;;  %v2085_v34 = vld [vmem:[#allocation4 + $0x350] sm:$0xff]  ;;  %v2138_v25 = vld [vmem:[#allocation4 + $0x4f8] sm:$0xff] }
 0x25d   :  { %3771 = vmatprep.subr.bf16.mxu1 %v4434_v35  ;;  %v2089_v35 = vld [vmem:[#allocation4 + $0x370] sm:$0xff] }
 0x25e   :  { %v4495_v19 = vcombine.low %v2085_v34, %v2089_v35 }
 0x25f   :  { %3690 = vmatpush1.bf16.msra.mxu0 %v4431_v37  ;;  %v4496_v37 = vcombine.high %v2085_v34, %v2089_v35  ;;  %v2146_v34 = vld [vmem:[#allocation4 + $0x538] sm:$0xff]  ;;  %v4545_v35 = vcombine.low %v2134_v24, %v2138_v25 }
 0x260   :  { %3772 = vmatpush1.bf16.msra.mxu1 %v4433_v17  ;;  %3691 = vmatprep.subr.bf16.mxu0 %v4440_v18  ;;  %v4498_v17 = vcombine.high %v2086_v8, %v2090_v14  ;;  %v2093_v18 = vld [vmem:[#allocation4 + $0x390] sm:$0xff] }
 0x261   :  { %3773 = vmatprep.subr.bf16.mxu1 %v4442_v21  ;;  %v2097_v21 = vld [vmem:[#allocation4 + $0x3b0] sm:$0xff] }
 0x262   :  { %v4503_v44 = vcombine.low %v2093_v18, %v2097_v21 }
 0x263   :  { %3692 = vmatpush1.bf16.msra.mxu0 %v4439_v27  ;;  %v4504_v27 = vcombine.high %v2093_v18, %v2097_v21 }
 0x264   :  { %3774 = vmatpush1.bf16.msra.mxu1 %v4441_v32  ;;  %3693 = vmatprep.subr.bf16.mxu0 %v4448_v39  ;;  %v4506_v32 = vcombine.high %v2094_v38, %v2098_v22  ;;  %v2101_v39 = vld [vmem:[#allocation4 + $0x3d0] sm:$0xff] }
 0x265   :  { %3775 = vmatprep.subr.bf16.mxu1 %v4450_v41  ;;  %v2105_v41 = vld [vmem:[#allocation4 + $0x3f0] sm:$0xff] }
 0x266   :  { %v4511_v52 = vcombine.low %v2101_v39, %v2105_v41 }
 0x267   :  { %3694 = vmatpush1.bf16.msra.mxu0 %v4447_v46  ;;  %v4512_v46 = vcombine.high %v2101_v39, %v2105_v41 }
 0x268   :  { %3776 = vmatpush1.bf16.msra.mxu1 %v4449_v47  ;;  %3695 = vmatprep.subr.bf16.mxu0 %v4456_v48  ;;  %v4514_v47 = vcombine.high %v2102_v42, %v2106_v43  ;;  %v2109_v48 = vld [vmem:[#allocation4 + $0x410] sm:$0xff] }
 0x269   :  { %3777 = vmatprep.subr.bf16.mxu1 %v4458_v49  ;;  %v2113_v49 = vld [vmem:[#allocation4 + $0x430] sm:$0xff] }
 0x26a   :  { %v4519_v59 = vcombine.low %v2109_v48, %v2113_v49 }
 0x26b   :  { %3696 = vmatpush1.bf16.msra.mxu0 %v4455_v54  ;;  %v4520_v54 = vcombine.high %v2109_v48, %v2113_v49 }
 0x26c   :  { %3778 = vmatpush1.bf16.msra.mxu1 %v4457_v55  ;;  %3697 = vmatprep.subr.bf16.mxu0 %v4464_v56  ;;  %v4522_v55 = vcombine.high %v2110_v50, %v2114_v51  ;;  %v2117_v56 = vld [vmem:[#allocation4 + $0x450] sm:$0xff] }
 0x26d   :  { %3779 = vmatprep.subr.bf16.mxu1 %v4466_v58  ;;  %v2121_v58 = vld [vmem:[#allocation4 + $0x470] sm:$0xff] }
 0x26e   :  { %v4527_v7 = vcombine.low %v2117_v56, %v2121_v58 }
 0x26f   :  { %3698 = vmatpush1.bf16.msra.mxu0 %v4463_v1  ;;  %v4528_v1 = vcombine.high %v2117_v56, %v2121_v58 }
 0x270   :  { %3780 = vmatpush1.bf16.msra.mxu1 %v4465_v2  ;;  %3699 = vmatprep.subr.bf16.mxu0 %v4472_v3  ;;  %v2125_v2 = vld [vmem:[#allocation4 + $0x490] sm:$0xff] }
 0x271   :  { %3781 = vmatprep.subr.bf16.mxu1 %v4474_v4  ;;  %v2129_v3 = vld [vmem:[#allocation4 + $0x4b0] sm:$0xff]  ;;  %v4530_v4 = vcombine.high %v2118_v60, %v2122_v61 }
 0x272   :  { %v4535_v26 = vcombine.low %v2125_v2, %v2129_v3  ;;  %v2181_v61 = vld [vmem:[#allocation4 + $0x650] sm:$0xff] }
 0x273   :  { %3700 = vmatpush1.bf16.msra.mxu0 %v4471_v16  ;;  %v4536_v16 = vcombine.high %v2125_v2, %v2129_v3  ;;  %v2186_v2 = vld [vmem:[#allocation4 + $0x678] sm:$0xff] }
 0x274   :  { %3782 = vmatpush1.bf16.msra.mxu1 %v4473_v11  ;;  %3701 = vmatprep.subr.bf16.mxu0 %v4480_v13  ;;  %v4538_v11 = vcombine.high %v2126_v5, %v2130_v6  ;;  %v2133_v13 = vld [vmem:[#allocation4 + $0x4d0] sm:$0xff] }
 0x275   :  { %3783 = vmatprep.subr.bf16.mxu1 %v4482_v23  ;;  %v2137_v23 = vld [vmem:[#allocation4 + $0x4f0] sm:$0xff] }
 0x276   :  { %v4544_v28 = vcombine.high %v2133_v13, %v2137_v23 }
 0x277   :  { %3702 = vmatpush1.bf16.msra.mxu0 %v4479_v12  ;;  %v4546_v12 = vcombine.high %v2134_v24, %v2138_v25 }
 0x278   :  { %3784 = vmatpush1.bf16.msra.mxu1 %v4481_v30  ;;  %3703 = vmatprep.subr.bf16.mxu0 %v4488_v31  ;;  %v2141_v30 = vld [vmem:[#allocation4 + $0x510] sm:$0xff] }
 0x279   :  { %3785 = vmatprep.subr.bf16.mxu1 %v4490_v33  ;;  %v2145_v31 = vld [vmem:[#allocation4 + $0x530] sm:$0xff]  ;;  %v2142_v33 = vld [vmem:[#allocation4 + $0x518] sm:$0xff] }
 0x27a   :  { %v4552_v8 = vcombine.high %v2141_v30, %v2145_v31  ;;  %v4554_v14 = vcombine.high %v2142_v33, %v2146_v34  ;;  %v4551_v18 = vcombine.low %v2141_v30, %v2145_v31  ;;  %v4553_v21 = vcombine.low %v2142_v33, %v2146_v34 }
 0x27b   :  { %3704 = vmatpush1.bf16.msra.mxu0 %v4487_v29  ;;  %v2149_v29 = vld [vmem:[#allocation4 + $0x550] sm:$0xff] }
 0x27c   :  { %3786 = vmatpush1.bf16.msra.mxu1 %v4489_v36  ;;  %3705 = vmatprep.subr.bf16.mxu0 %v4496_v37  ;;  %v2153_v36 = vld [vmem:[#allocation4 + $0x570] sm:$0xff]  ;;  %v2150_v37 = vld [vmem:[#allocation4 + $0x558] sm:$0xff] }
 0x27d   :  { %3787 = vmatprep.subr.bf16.mxu1 %v4498_v17  ;;  %v2154_v17 = vld [vmem:[#allocation4 + $0x578] sm:$0xff]  ;;  %v4560_v38 = vcombine.high %v2149_v29, %v2153_v36  ;;  %v4559_v39 = vcombine.low %v2149_v29, %v2153_v36 }
 0x27e   :  { %v4562_v22 = vcombine.high %v2150_v37, %v2154_v17  ;;  %v4561_v41 = vcombine.low %v2150_v37, %v2154_v17 }
 0x27f   :  { %3706 = vmatpush1.bf16.msra.mxu0 %v4495_v19  ;;  %v2157_v19 = vld [vmem:[#allocation4 + $0x590] sm:$0xff] }
 0x280   :  { %3788 = vmatpush1.bf16.msra.mxu1 %v4497_v53  ;;  %3707 = vmatprep.subr.bf16.mxu0 %v4504_v27  ;;  %v2161_v53 = vld [vmem:[#allocation4 + $0x5b0] sm:$0xff]  ;;  %v2158_v27 = vld [vmem:[#allocation4 + $0x598] sm:$0xff] }
 0x281   :  { %3789 = vmatprep.subr.bf16.mxu1 %v4506_v32  ;;  %v2162_v32 = vld [vmem:[#allocation4 + $0x5b8] sm:$0xff]  ;;  %v4568_v42 = vcombine.high %v2157_v19, %v2161_v53  ;;  %v4567_v48 = vcombine.low %v2157_v19, %v2161_v53 }
 0x282   :  { %v4570_v43 = vcombine.high %v2158_v27, %v2162_v32  ;;  %v4569_v49 = vcombine.low %v2158_v27, %v2162_v32 }
 0x283   :  { %3708 = vmatpush1.bf16.msra.mxu0 %v4503_v44  ;;  %v2165_v44 = vld [vmem:[#allocation4 + $0x5d0] sm:$0xff] }
 0x284   :  { %3790 = vmatpush1.bf16.msra.mxu1 %v4505_v45  ;;  %3709 = vmatprep.subr.bf16.mxu0 %v4512_v46  ;;  %v2169_v45 = vld [vmem:[#allocation4 + $0x5f0] sm:$0xff]  ;;  %v2166_v46 = vld [vmem:[#allocation4 + $0x5d8] sm:$0xff] }
 0x285   :  { %3791 = vmatprep.subr.bf16.mxu1 %v4514_v47  ;;  %v2170_v47 = vld [vmem:[#allocation4 + $0x5f8] sm:$0xff]  ;;  %v4576_v50 = vcombine.high %v2165_v44, %v2169_v45  ;;  %v4575_v56 = vcombine.low %v2165_v44, %v2169_v45 }
 0x286   :  { %v4578_v51 = vcombine.high %v2166_v46, %v2170_v47  ;;  %v4577_v58 = vcombine.low %v2166_v46, %v2170_v47 }
 0x287   :  { %3710 = vmatpush1.bf16.msra.mxu0 %v4511_v52  ;;  %v2173_v52 = vld [vmem:[#allocation4 + $0x610] sm:$0xff] }
 0x288   :  { %3792 = vmatpush1.bf16.msra.mxu1 %v4513_v15  ;;  %3720 = vmatprep.subr.bf16.mxu0 %v4520_v54  ;;  %v2177_v15 = vld [vmem:[#allocation4 + $0x630] sm:$0xff]  ;;  %v2174_v54 = vld [vmem:[#allocation4 + $0x618] sm:$0xff] }
 0x289   :  { %3802 = vmatprep.subr.bf16.mxu1 %v4522_v55  ;;  %v2178_v55 = vld [vmem:[#allocation4 + $0x638] sm:$0xff]  ;;  %v4583_v3 = vcombine.low %v2173_v52, %v2177_v15 }
 0x28a   :  { %3712 = vmatmul.mubr.bf16.vlgmr.msra.gmra.mrb[20].mxu0 %v4972_v20  ;;  %v4586_v60 = vcombine.high %v2174_v54, %v2178_v55 }
 0x28b   :  { %3794 = vmatmul.mubr.bf16.vlgmr.msra.gmra.mrb[20].mxu1 %v4972_v20  ;;  %3721 = vmatpush1.bf16.msra.mxu0 %v4519_v59  ;;  %v4537_v20 = vcombine.low %v2126_v5, %v2130_v6  ;;  %v4584_v59 = vcombine.high %v2173_v52, %v2177_v15 }
 0x28c   :  { %3752 = vmatprep.mubr.bf16.mxu0 %v4976_v40  ;;  %3803 = vmatpush1.bf16.msra.mxu1 %v4521_v62  ;;  %v2185_v62 = vld [vmem:[#allocation4 + $0x670] sm:$0xff] }
 0x28d   :  { %3834 = vmatprep.mubr.bf16.mxu1 %v4976_v40  ;;  %3722 = vmatprep.subr.bf16.mxu0 %v4528_v1  ;;  %v4543_v40 = vcombine.low %v2133_v13, %v2137_v23  ;;  %v2182_v1 = vld [vmem:[#allocation4 + $0x658] sm:$0xff]  ;;  %v4592_v5 = vcombine.high %v2181_v61, %v2185_v62  ;;  %v4591_v13 = vcombine.low %v2181_v61, %v2185_v62  ;;  %v4725_v61 = vld [vmem:[%s5073_s5 + $0x48] sm:$0xff]  }
 0x28e   :  { %3804 = vmatprep.subr.bf16.mxu1 %v4530_v4  ;;  %v4585_v4 = vcombine.low %v2174_v54, %v2178_v55  ;;  %v4594_v6 = vcombine.high %v2182_v1, %v2186_v2  ;;  %v4593_v23 = vcombine.low %v2182_v1, %v2186_v2  ;;  %v4726_v62 = vld [vmem:[%s5073_s5 + $0x8] sm:$0xff]   ;;  %v4727_v1 = vld [vmem:[%s5073_s5 + $0x50] sm:$0xff]  }
 0x28f   :  { %3723 = vmatpush1.bf16.msra.mxu0 %v4527_v7  ;;  %v2189_v7 = vld [vmem:[#allocation4 + $0x690] sm:$0xff] }
 0x290   :  { %3805 = vmatpush1.bf16.msra.mxu1 %v4529_v10  ;;  %3724 = vmatprep.subr.bf16.mxu0 %v4536_v16  ;;  %v2193_v10 = vld [vmem:[#allocation4 + $0x6b0] sm:$0xff]  ;;  %v2190_v16 = vld [vmem:[#allocation4 + $0x698] sm:$0xff] }
 0x291   :  { %3806 = vmatprep.subr.bf16.mxu1 %v4538_v11  ;;  %v2194_v11 = vld [vmem:[#allocation4 + $0x6b8] sm:$0xff]  ;;  %v4600_v24 = vcombine.high %v2189_v7, %v2193_v10  ;;  %v4599_v30 = vcombine.low %v2189_v7, %v2193_v10  ;;  %v4728_v2 = vld [vmem:[%s5073_s5 + $0x10] sm:$0xff]  }
 0x292   :  { %v4602_v25 = vcombine.high %v2190_v16, %v2194_v11  ;;  %v4601_v31 = vcombine.low %v2190_v16, %v2194_v11 }
 0x293   :  { %3725 = vmatpush1.bf16.msra.mxu0 %v4535_v26  ;;  %v2197_v26 = vld [vmem:[#allocation4 + $0x6d0] sm:$0xff] }
 0x294   :  { %3807 = vmatpush1.bf16.msra.mxu1 %v4537_v20  ;;  %3726 = vmatprep.subr.bf16.mxu0 %v4544_v28  ;;  %v2201_v20 = vld [vmem:[#allocation4 + $0x6f0] sm:$0xff]  ;;  %v2198_v28 = vld [vmem:[#allocation4 + $0x6d8] sm:$0xff] }
 0x295   :  { %3808 = vmatprep.subr.bf16.mxu1 %v4546_v12  ;;  %v2202_v12 = vld [vmem:[#allocation4 + $0x6f8] sm:$0xff]  ;;  %v4608_v33 = vcombine.high %v2197_v26, %v2201_v20  ;;  %v4607_v29 = vcombine.low %v2197_v26, %v2201_v20  ;;  %v4734_v26 = vld [vmem:[%s5073_s5 + $0x28] sm:$0xff]  }
 0x296   :  { %v4610_v34 = vcombine.high %v2198_v28, %v2202_v12  ;;  %v4609_v36 = vcombine.low %v2198_v28, %v2202_v12  ;;  %v4735_v12 = vld [vmem:[%s5073_s5 + $0x70] sm:$0xff]  }
 0x297   :  { %3727 = vmatpush1.bf16.msra.mxu0 %v4543_v40  ;;  %v2205_v40 = vld [vmem:[#allocation4 + $0x710] sm:$0xff] }
 0x298   :  { %3809 = vmatpush1.bf16.msra.mxu1 %v4545_v35  ;;  %3728 = vmatprep.subr.bf16.mxu0 %v4552_v8  ;;  %v2209_v35 = vld [vmem:[#allocation4 + $0x730] sm:$0xff]  ;;  %v2206_v8 = vld [vmem:[#allocation4 + $0x718] sm:$0xff] }
 0x299   :  { %3810 = vmatprep.subr.bf16.mxu1 %v4554_v14  ;;  %v2210_v14 = vld [vmem:[#allocation4 + $0x738] sm:$0xff]  ;;  %v4616_v37 = vcombine.high %v2205_v40, %v2209_v35  ;;  %v4615_v19 = vcombine.low %v2205_v40, %v2209_v35  ;;  %v3849_v40 = vld [vmem:[%s5072_s4] sm:$0x3] }
 0x29a   :  { %v4618_v17 = vcombine.high %v2206_v8, %v2210_v14  ;;  %v4617_v53 = vcombine.low %v2206_v8, %v2210_v14 }
 0x29b   :  { %3729 = vmatpush1.bf16.msra.mxu0 %v4551_v18  ;;  %v2213_v18 = vld [vmem:[#allocation4 + $0x750] sm:$0xff] }
 0x29c   :  { %3811 = vmatpush1.bf16.msra.mxu1 %v4553_v21  ;;  %3730 = vmatprep.subr.bf16.mxu0 %v4560_v38  ;;  %v2217_v21 = vld [vmem:[#allocation4 + $0x770] sm:$0xff]  ;;  %v2214_v38 = vld [vmem:[#allocation4 + $0x758] sm:$0xff] }
 0x29d   :  { %3812 = vmatprep.subr.bf16.mxu1 %v4562_v22  ;;  %v2218_v22 = vld [vmem:[#allocation4 + $0x778] sm:$0xff]  ;;  %v4624_v27 = vcombine.high %v2213_v18, %v2217_v21  ;;  %v4623_v44 = vcombine.low %v2213_v18, %v2217_v21  ;;  %v3858_v21 = vrot.slane %v3849_v40, %v1953_v0 }
 0x29e   :  { %v4626_v32 = vcombine.high %v2214_v38, %v2218_v22  ;;  %v4625_v45 = vcombine.low %v2214_v38, %v2218_v22 }
 0x29f   :  { %3731 = vmatpush1.bf16.msra.mxu0 %v4559_v39  ;;  %v2221_v39 = vld [vmem:[#allocation4 + $0x790] sm:$0xff] }
 0x2a0   :  { %3813 = vmatpush1.bf16.msra.mxu1 %v4561_v41  ;;  %3732 = vmatprep.subr.bf16.mxu0 %v4568_v42  ;;  %v2225_v41 = vld [vmem:[#allocation4 + $0x7b0] sm:$0xff]  ;;  %v2222_v42 = vld [vmem:[#allocation4 + $0x798] sm:$0xff] }
 0x2a1   :  { %3814 = vmatprep.subr.bf16.mxu1 %v4570_v43  ;;  %v2226_v43 = vld [vmem:[#allocation4 + $0x7b8] sm:$0xff]  ;;  %v4632_v46 = vcombine.high %v2221_v39, %v2225_v41  ;;  %v4631_v52 = vcombine.low %v2221_v39, %v2225_v41 }
 0x2a2   :  { %v4634_v47 = vcombine.high %v2222_v42, %v2226_v43  ;;  %v4633_v15 = vcombine.low %v2222_v42, %v2226_v43 }
 0x2a3   :  { %3733 = vmatpush1.bf16.msra.mxu0 %v4567_v48  ;;  %v2229_v48 = vld [vmem:[#allocation4 + $0x7d0] sm:$0xff] }
 0x2a4   :  { %3815 = vmatpush1.bf16.msra.mxu1 %v4569_v49  ;;  %3734 = vmatprep.subr.bf16.mxu0 %v4576_v50  ;;  %v2233_v49 = vld [vmem:[#allocation4 + $0x7f0] sm:$0xff]  ;;  %v2230_v50 = vld [vmem:[#allocation4 + $0x7d8] sm:$0xff] }
 0x2a5   :  { %3816 = vmatprep.subr.bf16.mxu1 %v4578_v51  ;;  %v2234_v51 = vld [vmem:[#allocation4 + $0x7f8] sm:$0xff]  ;;  %v4640_v54 = vcombine.high %v2229_v48, %v2233_v49 }
 0x2a6   :  { %v4642_v55 = vcombine.high %v2230_v50, %v2234_v51 }
 0x2a7   :  { %3735 = vmatpush1.bf16.msra.mxu0 %v4575_v56  ;;  %v4639_v56 = vcombine.low %v2229_v48, %v2233_v49 }
 0x2a8   :  { %3817 = vmatpush1.bf16.msra.mxu1 %v4577_v58  ;;  %3736 = vmatprep.subr.bf16.mxu0 %v4584_v59  ;;  %v4641_v58 = vcombine.low %v2230_v50, %v2234_v51  ;;  %v4723_v59 = vld [vmem:[%s5073_s5 + $0x40] sm:$0xff]  }
 0x2a9   :  { %3818 = vmatprep.subr.bf16.mxu1 %v4586_v60  ;;  %v4724_v60 = vld [vmem:[%s5073_s5] sm:$0xff]  }
 0x2ab   :  { %3737 = vmatpush1.bf16.msra.mxu0 %v4583_v3  ;;  %v4730_v3 = vld [vmem:[%s5073_s5 + $0x18] sm:$0xff]  }
 0x2ac   :  { %3819 = vmatpush1.bf16.msra.mxu1 %v4585_v4  ;;  %3738 = vmatprep.subr.bf16.mxu0 %v4592_v5  ;;  %v4731_v4 = vld [vmem:[%s5073_s5 + $0x60] sm:$0xff]  }
 0x2ad   :  { %3820 = vmatprep.subr.bf16.mxu1 %v4594_v6  ;;  %v4732_v5 = vld [vmem:[%s5073_s5 + $0x20] sm:$0xff]  }
 0x2af   :  { %3739 = vmatpush1.bf16.msra.mxu0 %v4591_v13  ;;  %v4733_v13 = vld [vmem:[%s5073_s5 + $0x68] sm:$0xff]  }
 0x2b0   :  { %3821 = vmatpush1.bf16.msra.mxu1 %v4593_v23  ;;  %3740 = vmatprep.subr.bf16.mxu0 %v4600_v24 }
 0x2b1   :  { %3822 = vmatprep.subr.bf16.mxu1 %v4602_v25 }
 0x2b3   :  { %3741 = vmatpush1.bf16.msra.mxu0 %v4599_v30  ;;  %v4736_v30 = vld [vmem:[%s5073_s5 + $0x30] sm:$0xff]  }
 0x2b4   :  { %3823 = vmatpush1.bf16.msra.mxu1 %v4601_v31  ;;  %3742 = vmatprep.subr.bf16.mxu0 %v4608_v33  ;;  %v4737_v31 = vld [vmem:[%s5073_s5 + $0x78] sm:$0xff]  }
 0x2b5   :  { %3824 = vmatprep.subr.bf16.mxu1 %v4610_v34  ;;  %v4738_v33 = vld [vmem:[%s5073_s5 + $0x38] sm:$0xff]   ;;  %v4799_v34 = vmov 0.0  }
 0x2b7   :  { %3743 = vmatpush1.bf16.msra.mxu0 %v4607_v29 }
 0x2b8   :  { %3825 = vmatpush1.bf16.msra.mxu1 %v4609_v36  ;;  %3744 = vmatprep.subr.bf16.mxu0 %v4616_v37  ;;  %v3854_v36 = vrot.slane %v3849_v40, %v1949_v63  ;;  %v4739_v63 = vld [vmem:[%s5075_s7] sm:$0xff]  }
 0x2b9   :  { %3826 = vmatprep.subr.bf16.mxu1 %v4618_v17 }
 0x2bb   :  { %3745 = vmatpush1.bf16.msra.mxu0 %v4615_v19 }
 0x2bc   :  { %3827 = vmatpush1.bf16.msra.mxu1 %v4617_v53  ;;  %3746 = vmatprep.subr.bf16.mxu0 %v4624_v27 }
 0x2bd   :  { %3828 = vmatprep.subr.bf16.mxu1 %v4626_v32 }
 0x2bf   :  { %3747 = vmatpush1.bf16.msra.mxu0 %v4623_v44 }
 0x2c0   :  { %3829 = vmatpush1.bf16.msra.mxu1 %v4625_v45  ;;  %3748 = vmatprep.subr.bf16.mxu0 %v4632_v46  ;;  %v4643_v45 = vld [vmem:[%s5074_s6] ss:$0 sm:$0xff] }
 0x2c1   :  { %3830 = vmatprep.subr.bf16.mxu1 %v4634_v47 }
 0x2c3   :  { %3749 = vmatpush1.bf16.msra.mxu0 %v4631_v52  ;;  %v4660_v52 = vld [vmem:[%s5076_s8] ss:$0 sm:$0xff] }
 0x2c4   :  { %3831 = vmatpush1.bf16.msra.mxu1 %v4633_v15  ;;  %3750 = vmatprep.subr.bf16.mxu0 %v4640_v54 }
 0x2c5   :  { %3832 = vmatprep.subr.bf16.mxu1 %v4642_v55 }
 0x2c7   :  { %3751 = vmatpush1.bf16.msra.mxu0 %v4639_v56 }
 0x2c8   :  { %3833 = vmatpush1.bf16.msra.mxu1 %v4641_v58  ;;  %4664 = vmatprep.subr.bf16.mxu0 %v4723_v59 }
 0x2c9   :  { %4689 = vmatprep.subr.bf16.mxu1 %v4799_v34 }
 0x2ca   :  { %3753 = vmatmul.mubr.bf16.vlgmr.msra.gmra.mrb[20].mxu0 %v4983_v57 }
 0x2cb   :  { %3835 = vmatmul.mubr.bf16.vlgmr.msra.gmra.mrb[20].mxu1 %v4983_v57  ;;  %4665 = vmatpush3.bf16.msra.mxu0 %v4724_v60  ;;  %v4729_v57 = vld [vmem:[%s5073_s5 + $0x58] sm:$0xff]  }
 0x2cc   :  { %4666 = vmatprep.subr.bf16.mxu0 %v4725_v61  ;;  %4690 = vmatpush3.bf16.msra.mxu1 %v4739_v63 }
 0x2cd   :  { %4691 = vmatprep.subr.bf16.mxu1 %v4799_v34  ;;  %4693 = vmatprep.mubr.msk.bf16.mxu1 %vm4800_vm0, %v4799_v34 }
 0x2cf   :  { %4667 = vmatpush3.bf16.msra.mxu0 %v4726_v62 }
 0x2d0   :  { %4668 = vmatprep.subr.bf16.mxu0 %v4727_v1  ;;  %4692 = vmatpush3.bf16.msra.mxu1 %v4740_v9 }
 0x2d3   :  { %4669 = vmatpush3.bf16.msra.mxu0 %v4728_v2 }
 0x2d4   :  { %4670 = vmatprep.subr.bf16.mxu0 %v4729_v57 }
 0x2d7   :  { %4671 = vmatpush3.bf16.msra.mxu0 %v4730_v3 }
 0x2d8   :  { %4672 = vmatprep.subr.bf16.mxu0 %v4731_v4 }
 0x2db   :  { %4673 = vmatpush3.bf16.msra.mxu0 %v4732_v5 }
 0x2dc   :  { %4674 = vmatprep.subr.bf16.mxu0 %v4733_v13 }
 0x2df   :  { %4675 = vmatpush3.bf16.msra.mxu0 %v4734_v26 }
 0x2e0   :  { %4676 = vmatprep.subr.bf16.mxu0 %v4735_v12 }
 0x2e3   :  { %4677 = vmatpush3.bf16.msra.mxu0 %v4736_v30 }
 0x2e4   :  { %4678 = vmatprep.subr.bf16.mxu0 %v4737_v31 }
 0x2e7   :  { %4679 = vmatpush3.bf16.msra.mxu0 %v4738_v33 }
 0x31d   :  { %v3590_v6 = vpop.f32.mrb[16].mxu0  ;;  %v3672_v7 = vpop.f32.mrb[16].mxu1 }
 0x31e   :  { %v3843_v10 = vmax.f32 %v3590_v6, %v3672_v7  ;;  %v3592_v16 = vpop.f32.mrb[17].mxu0  ;;  %v3674_v11 = vpop.f32.mrb[17].mxu1 }
 0x31f   :  { %v3844_v23 = vmax.f32 %v3592_v16, %v3674_v11  ;;  %v3594_v24 = vpop.f32.mrb[18].mxu0  ;;  %v3676_v25 = vpop.f32.mrb[18].mxu1 }
 0x320   :  { %v3595_v20 = vpop.f32.mrb[19].mxu0  ;;  %v3677_v28 = vpop.f32.mrb[19].mxu1 }
 0x39d   :  { %v3754_v35 = vpop.f32.mrb[20].mxu0 }
 0x39e   :  { %v3836_v8 = vpop.f32.mrb[20].mxu1  ;;  %v3756_v14 = vpop.f32.mrb[21].mxu0 }
 0x39f   :  { %v3845_v29 = vmax.f32 %v3754_v35, %v3836_v8  ;;  %v3838_v37 = vpop.f32.mrb[21].mxu1  ;;  %v3758_v17 = vpop.f32.mrb[22].mxu0 }
 0x3a0   :  { %v3846_v18 = vmax.f32 %v3756_v14, %v3838_v37  ;;  %v3840_v38 = vpop.f32.mrb[22].mxu1  ;;  %v3759_v22 = vpop.f32.mrb[23].mxu0 }
 0x3a1   :  { %v3847_v19 = vmax.f32 %v3843_v10, %v3845_v29  ;;  %v3841_v53 = vpop.f32.mrb[23].mxu1 }
 0x3a2   :  { %v3848_v27 = vmax.f32 %v3844_v23, %v3846_v18 }
 0x3a3   :  { %v3861_v32 = vadd.f32 %v3854_v36, %v3847_v19 }
 0x3a4   :  { %v3862_v39 = vadd.f32 %v3858_v21, %v3848_v27 }
 0x3a5   :  { %v3863_v41 = vmax.f32 %v3861_v32, 0.0 }
 0x3a6   :  { %v3864_v42 = vmax.f32 %v3862_v39, 0.0 }
 0x3a7   :  { %v3865_v44 = vpack.c.bf16 %v3863_v41, %v3863_v41 }
 0x3a8   :  { %v3866_v43 = vpack.c.bf16 %v3864_v42, %v3864_v42 }
 0x3aa   :  { %4034 = vmatprep.mubr.bf16.mxu0 %v3866_v43 }
 0x3ab   :  { %4035 = vmatmul.mubr.bf16.vlgmr.msra.gmra.mrb[24].mxu0 %v3865_v44 }
 0x47e   :  { %v4680_v0 = vpop.f32.mrb[24].mxu0 }
 0x47f   :  { %v4681_v46 = vpop.f32.mrb[25].mxu0 }
 0x480   :  { %v4682_v47 = vadd.f32 %v4681_v46, %v4680_v0  ;;  %v4683_v48 = vpop.f32.mrb[26].mxu0 }
 0x481   :  { %v4684_v49 = vpop.f32.mrb[27].mxu0 }
 0x482   :  { %v4037_v50 = vadd.f32 %v4682_v47, %v4643_v45 }
 0x484   :  { %v4042_v51 = vpack.c.bf16 %v4037_v50, %v4037_v50 }
 0x486   :  { %4694 = vmatmul.mubr.msk.bf16.vlgmr.msra.gmra.mrb[24].mxu1 %vm4066_vm1, %v4042_v51 }
 0x559   :  { %v4104_v15 = vpop.f32.mrb[24].mxu1 }
 0x55a   :  { %v4105_v54 = vadd.f32 %v4660_v52, %v4104_v15  ;;  %v4695_v55 = vpop.f32.mrb[25].mxu1 }
 0x55b   :  { %v4107_v56 = vpop.f32.mrb[26].mxu1 }
 0x55c   :  { %v4696_v58 = vpop.f32.mrb[27].mxu1  ;;  %v4111_v59 = vsel %vm4110_vm2, %v4105_v54, -inf }
 0x55d   :  { %4112 = vmax.xlane.f32.xlu0 %v4111_v59 }
 0x5ea   :  { %v4113_v60 = vpop.xlane.xlu0 %4112 }
 0x5eb   :  { %v4114_v61 = vsub.f32 %v4105_v54, %v4113_v60 }
 0x5ed   :  { %v4115_v62 = vmul.f32 1.442695, %v4114_v61 }
 0x5ef   :  { %4741 = vpow2.f32 %v4115_v62 }
 0x5f9   :  { %v4742_v1 = vpop.eup %4741 }
 0x5fa   :  { %v4117_v2 = vsel %vm4110_vm2, %v4742_v1, 0.0 }
 0x5fb   :  { %4118 = vadd.xlane.f32.xlu0 %v4117_v2 }
 0x688   :  { %v4119_v57 = vpop.xlane.xlu0 %4118 }
 0x689   :  { %4743 = vrcp.f32 %v4119_v57 }
 0x693   :  { %v4744_v3 = vpop.eup %4743 }
 0x694   :  { %v4121_v4 = vmul.f32 %v4744_v3, %v4742_v1 }
 0x696   :  { %4122 = vst.msk [vmem:[%s5077_s9] sm:$0xff] %vm4110_vm2, %v4121_v4 }
 0x697   :  { %4127 = vsyncpa [#allocation3], 1 }
 0x698   :  { %4128 = vsyncpa [#allocation5], 1 }

</bundles_post_ra>
